<compile_context>
chip_gen: v7x
topology: tpu7x:2x2x1
jax: 0.10.0
libtpu: 0.0.40
codegen_flags: <defaults>
</compile_context>

<pallas_src>
import functools

import jax
import jax.numpy as jnp
from jax.experimental import pallas as pl
from jax.experimental.pallas import tpu as pltpu

SELU_ALPHA = 1.6732632423543772
SELU_SCALE = 1.0507009873554805

# Set to jnp.bfloat16 on v6e/v7x for full-rate MXU and halved operand DMA
# (accumulation stays f32).  Kept at f32 here to match the PyTorch reference
# precision at this tiny problem size.
MATMUL_INPUT_DTYPE = jnp.float32


def _selu(v):
    # Clamped exp keeps the branch not selected by `where` finite.
    # (expm1 would be marginally more accurate near 0; clamp + exp is
    #  guaranteed to lower and the difference is ~1e-7 absolute.)
    neg = SELU_ALPHA * (jnp.exp(jnp.minimum(v, 0.0)) - 1.0)
    return SELU_SCALE * jnp.where(v > 0.0, v, neg)


# ----------------------------- Pallas kernels ------------------------------

def gcn_pool_kernel(x_ref, fc_ref, sc_ref, w_ref, gw_ref, gb_ref,
                    pr_ref, pc_ref, o_ref):
    """One batch element of AvgPool2d(2,2)(selu(block_adj @ (x @ W) + b)).

    block_adj = [[FC, diag(w)], [diag(w), SC]] is never materialized.
    """
    dt = MATMUL_INPUT_DTYPE
    x = x_ref[0].astype(dt)                                   # (160, F)
    gw = gw_ref[...].astype(dt)                               # (F, 40)
    sup = jnp.dot(x, gw, preferred_element_type=jnp.float32)  # (160, 40)
    sup_top = sup[0:80, :]                                    # (80, 40)
    sup_bot = sup[80:160, :]                                  # (80, 40)

    fc = fc_ref[0].astype(dt)                                 # (80, 80)
    sc = sc_ref[0].astype(dt)                                 # (80, 80)
    w = w_ref[...]                                            # (80, 1) diag weights
    b = gb_ref[...]                                           # (1, 40)

    # adj @ support, exploiting the 2x2 block structure of adj.
    top = (jnp.dot(fc, sup_top.astype(dt), preferred_element_type=jnp.float32)
           + w * sup_bot + b)
    bot = (jnp.dot(sc, sup_bot.astype(dt), preferred_element_type=jnp.float32)
           + w * sup_top + b)
    top = _selu(top)                                          # (80, 40)
    bot = _selu(bot)

    # Fused AvgPool2d(2,2): row pairs via pr (40,80), column pairs via pc (40,20).
    pr = pr_ref[...]
    pc = pc_ref[...]
    top_p = jnp.dot(jnp.dot(pr, top, preferred_element_type=jnp.float32), pc,
                    preferred_element_type=jnp.float32)       # (40, 20)
    bot_p = jnp.dot(jnp.dot(pr, bot, preferred_element_type=jnp.float32), pc,
                    preferred_element_type=jnp.float32)       # (40, 20)
    o_ref[0, 0:40, :] = 0.25 * top_p
    o_ref[0, 40:80, :] = 0.25 * bot_p


def head_kernel(apply_sigmoid, l1_ref, w1_ref, b1_ref, sm_ref,
                w2a_ref, w2b_ref, b2_ref, o_ref):
    """(BatchNorm-folded) fc1 -> ReLU -> [concat scanner] -> fc2 -> (sigmoid)."""
    l2 = jnp.dot(l1_ref[...], w1_ref[...],
                 preferred_element_type=jnp.float32) + b1_ref[...]
    l2 = jnp.maximum(l2, 0.0)                                 # (B, 128)
    # fc2(cat(l2, scanner)) == l2 @ W2[:128] + scanner * W2[128] + b2
    logits = (jnp.dot(l2, w2a_ref[...], preferred_element_type=jnp.float32)
              + sm_ref[...] * w2b_ref[...] + b2_ref[...])     # (B, out)
    if apply_sigmoid:
        logits = jax.nn.sigmoid(logits)
    o_ref[...] = logits


# --------------------------- pallas_call wrappers ---------------------------

def gcn_pooled_layer(x, fc, sc, w_col, gw, gb, pool_r, pool_c):
    """selu(gc1(x, block_adj)) fused with AvgPool2d(2,2).  Returns (B, 80, 20)."""
    B, N, F = x.shape
    H = gw.shape[1]
    nh = N // 2  # 80
    return pl.pallas_call(
        gcn_pool_kernel,
        out_shape=jax.ShapeDtypeStruct((B, N // 2, H // 2), jnp.float32),
        grid_spec=pltpu.PrefetchScalarGridSpec(
            num_scalar_prefetch=0,
            grid=(B,),
            in_specs=[
                pl.BlockSpec((1, N, F), lambda i: (i, 0, 0)),            # x
                pl.BlockSpec((1, nh, nh), lambda i: (i, 0, 0)),          # FC
                pl.BlockSpec((1, nh, nh), lambda i: (i, 0, 0)),          # SC
                pl.BlockSpec(w_col.shape, lambda i: (0, 0)),             # diag w (80,1)
                pl.BlockSpec(gw.shape, lambda i: (0, 0)),                # gc1 W (F,40)
                pl.BlockSpec((1, H), lambda i: (0, 0)),                  # gc1 b
                pl.BlockSpec(pool_r.shape, lambda i: (0, 0)),            # row pool (40,80)
                pl.BlockSpec(pool_c.shape, lambda i: (0, 0)),            # col pool (40,20)
            ],
            out_specs=pl.BlockSpec((1, N // 2, H // 2), lambda i: (i, 0, 0)),
        ),
        compiler_params=pltpu.CompilerParams(dimension_semantics=("parallel",)),
    )(x, fc, sc, w_col, gw, gb.reshape(1, H), pool_r, pool_c)


def gcn_general_l_w_forward(params, x, joint, task, scanner_machine):
    B, N, _ = x.shape
    assert N == 160, "architecture is fixed to 80 FC + 80 SC nodes"

    FC = joint[:, 0:80, 0:80]
    SC = joint[:, 80:160, 80:160]

    pooled = gcn_pooled_layer(x, FC, SC, params["w_col"], params["gc1_w"],
                              params["gc1_b"], params["pool_r"], params["pool_c"])
    # Dropout: identity in eval mode.
    # Free row-major reshape of the contiguous pooled slab: (B, 80, 20) -> (B, 1600).
    l1 = pooled.reshape(B, -1)

    out_dim = params["fc2_w_dense"].shape[1]
    vmem = pl.BlockSpec(memory_space=pltpu.MemorySpace.VMEM)
    pred = pl.pallas_call(
        functools.partial(head_kernel, task == "sex_predict"),
        out_shape=jax.ShapeDtypeStruct((B, out_dim), jnp.float32),
        in_specs=[vmem] * 7,
        out_specs=vmem,
    )(l1, params["fc1_w_folded"], params["fc1_b_folded"], scanner_machine,
      params["fc2_w_dense"], params["fc2_w_scan"], params["fc2_b2d"])
    return pred.reshape(B)


# ------------------------------- parameters ---------------------------------

def init_params(key, input_dim=64, hidden_dim=40, output_dim=1):
    k = jax.random.split(key, 10)
    flat = 80 * (hidden_dim // 2)  # 1600
    p = {}
    # learn_weight_layer: nn.Linear(1, 80)
    p["lw_w"] = jax.random.normal(k[0], (80, 1), jnp.float32) * 0.1
    p["lw_b"] = jax.random.normal(k[1], (80,), jnp.float32) * 0.1
    # gc1: GraphConvolution(input_dim, hidden_dim):  out = adj @ (x @ W) + b
    p["gc1_w"] = jax.random.normal(k[2], (input_dim, hidden_dim), jnp.float32) / jnp.sqrt(
        jnp.float32(input_dim))
    p["gc1_b"] = jax.random.normal(k[3], (hidden_dim,), jnp.float32) * 0.01
    # BatchNorm1d(1600), eval mode (non-trivial running stats to exercise the fold)
    p["bn_gamma"] = 1.0 + 0.1 * jax.random.normal(k[4], (flat,), jnp.float32)
    p["bn_beta"] = 0.1 * jax.random.normal(k[5], (flat,), jnp.float32)
    p["bn_mean"] = 0.1 * jax.random.normal(k[6], (flat,), jnp.float32)
    p["bn_var"] = jax.random.uniform(k[7], (flat,), jnp.float32, minval=0.5, maxval=1.5)
    # fc1: Linear(1600, 128), stored (in, out)
    p["fc1_w"] = jax.random.normal(k[8], (flat, 128), jnp.float32) * 0.02
    p["fc1_b"] = jnp.zeros((128,), jnp.float32)
    # fc2: Linear(129, output_dim)
    p["fc2_w"] = jax.random.normal(k[9], (129, output_dim), jnp.float32) * 0.05
    p["fc2_b"] = jnp.zeros((output_dim,), jnp.float32)
    return p


def prepare_inference_params(p, eps=1e-5):
    """One-time host-side folding (done at parameter-load time)."""
    prep = dict(p)
    # learn_weight_layer(ones(1)) then sigmoid -> fixed 80-vector at inference.
    w_vec = jax.nn.sigmoid(p["lw_w"][:, 0] + p["lw_b"])
    prep["w_col"] = w_vec.reshape(80, 1)
    # Fold eval-mode BatchNorm1d into fc1.
    scale = p["bn_gamma"] * jax.lax.rsqrt(p["bn_var"] + eps)
    shift = p["bn_beta"] - p["bn_mean"] * scale
    prep["fc1_w_folded"] = scale[:, None] * p["fc1_w"]                     # (1600, 128)
    prep["fc1_b_folded"] = (shift @ p["fc1_w"] + p["fc1_b"]).reshape(1, -1)
    # Split fc2 over the concatenated scanner column.
    prep["fc2_w_dense"] = p["fc2_w"][:128, :]
    prep["fc2_w_scan"] = p["fc2_w"][128:, :]
    prep["fc2_b2d"] = p["fc2_b"].reshape(1, -1)
    # AvgPool2d(2,2) expressed as two constant 0/1 matrices (row / column pairs).
    H = p["gc1_w"].shape[1]
    prep["pool_r"] = (jnp.arange(80) // 2 ==
                      jnp.arange(40)[:, None]).astype(jnp.float32)         # (40, 80)
    prep["pool_c"] = (jnp.arange(H)[:, None] // 2 ==
                      jnp.arange(H // 2)[None, :]).astype(jnp.float32)     # (40, 20)
    return prep


# ----------------------------- pure-JAX reference ----------------------------

def reference_forward(params, x, joint, task, scanner_machine, eps=1e-5):
    B = x.shape[0]
    hi = jax.lax.Precision.HIGHEST
    w_vec = jax.nn.sigmoid(params["lw_w"][:, 0] + params["lw_b"])
    FC = joint[:, 0:80, 0:80]
    SC = joint[:, 80:160, 80:160]
    mapcat = jnp.broadcast_to(jnp.diag(w_vec), (B, 80, 80))
    adj = jnp.concatenate([jnp.concatenate([FC, mapcat], axis=1),
                           jnp.concatenate([mapcat, SC], axis=1)], axis=2)
    support = jnp.einsum("bnf,fh->bnh", x, params["gc1_w"], precision=hi)
    h = jax.nn.selu(jnp.einsum("bnm,bmh->bnh", adj, support, precision=hi)
                    + params["gc1_b"])
    l1 = h.reshape(B, 80, 2, 20, 2).mean(axis=(2, 4)).reshape(B, -1)
    scale = params["bn_gamma"] / jnp.sqrt(params["bn_var"] + eps)
    l1 = (l1 - params["bn_mean"]) * scale + params["bn_beta"]
    l2 = jnp.maximum(jnp.dot(l1, params["fc1_w"], precision=hi) + params["fc1_b"], 0.0)
    l2 = jnp.concatenate([l2, scanner_machine], axis=1)
    logits = jnp.dot(l2, params["fc2_w"], precision=hi) + params["fc2_b"]
    if task == "sex_predict":
        logits = jax.nn.sigmoid(logits)
    return logits.reshape(B)


# ----------------------------------- main ------------------------------------

if __name__ == "__main__":
    key = jax.random.PRNGKey(0)
    kx, kj, ks, kp = jax.random.split(key, 4)

    B, N, F = 2, 160, 64            # 160 nodes (80 FC + 80 SC), hidden_dim = 40
    params = prepare_inference_params(init_params(kp, input_dim=F, hidden_dim=40,
                                                  output_dim=1))

    x = jax.random.normal(kx, (B, N, F), jnp.float32)
    joint = jax.random.normal(kj, (B, 160, 160), jnp.float32)
    scanner_machine = jax.random.normal(ks, (B, 1), jnp.float32)

    fwd = jax.jit(gcn_general_l_w_forward, static_argnums=3)
    pred = jax.block_until_ready(fwd(params, x, joint, "sex_predict", scanner_machine))

    assert pred.shape == (B,), pred.shape
    assert bool(jnp.all(jnp.isfinite(pred)))

    ref = reference_forward(params, x, joint, "sex_predict", scanner_machine)
    assert bool(jnp.allclose(pred, ref, rtol=2e-2, atol=2e-2)), (pred, ref)

    print("KERNEL_OK")
</pallas_src>

<mosaic_0001>
module attributes {stable_mosaic.version = 11 : i64} {
  func.func @gcn_pool_kernel(%arg0: i32, %arg1: memref<1x160x64xf32, #tpu.memory_space<vmem>>, %arg2: memref<1x80x80xf32, #tpu.memory_space<vmem>>, %arg3: memref<1x80x80xf32, #tpu.memory_space<vmem>>, %arg4: memref<80x1xf32, #tpu.memory_space<vmem>>, %arg5: memref<64x40xf32, #tpu.memory_space<vmem>>, %arg6: memref<1x40xf32, #tpu.memory_space<vmem>>, %arg7: memref<40x80xf32, #tpu.memory_space<vmem>>, %arg8: memref<40x20xf32, #tpu.memory_space<vmem>>, %arg9: memref<1x80x20xf32, #tpu.memory_space<vmem>>) attributes {dimension_semantics = [#tpu.dimension_semantics<parallel>], iteration_bounds = array<i64: 2>, scalar_prefetch = 0 : i64, scratch_operands = 0 : i64, tpu.core_type = #tpu.core_type<tc>, window_params = [{transform_indices = @transform_0, window_bounds = array<i64: 1, 160, 64>}, {transform_indices = @transform_1, window_bounds = array<i64: 1, 80, 80>}, {transform_indices = @transform_2, window_bounds = array<i64: 1, 80, 80>}, {pipeline_mode = #tpu.pipeline_mode<synchronous>, transform_indices = @transform_3, window_bounds = array<i64: 80, 1>}, {pipeline_mode = #tpu.pipeline_mode<synchronous>, transform_indices = @transform_4, window_bounds = array<i64: 64, 40>}, {pipeline_mode = #tpu.pipeline_mode<synchronous>, transform_indices = @transform_5, window_bounds = array<i64: 1, 40>}, {pipeline_mode = #tpu.pipeline_mode<synchronous>, transform_indices = @transform_6, window_bounds = array<i64: 40, 80>}, {pipeline_mode = #tpu.pipeline_mode<synchronous>, transform_indices = @transform_7, window_bounds = array<i64: 40, 20>}, {transform_indices = @transform_8, window_bounds = array<i64: 1, 80, 20>}]} {
    %c0 = arith.constant 0 : index
    %c0_0 = arith.constant 0 : index
    %c0_1 = arith.constant 0 : index
    %0 = vector.load %arg1[%c0, %c0_0, %c0_1] : memref<1x160x64xf32, #tpu.memory_space<vmem>>, vector<1x160x64xf32>
    %1 = vector.shape_cast %0 : vector<1x160x64xf32> to vector<160x64xf32>
    %c0_2 = arith.constant 0 : index
    %c0_3 = arith.constant 0 : index
    %2 = vector.load %arg5[%c0_2, %c0_3] : memref<64x40xf32, #tpu.memory_space<vmem>>, vector<64x40xf32>
    %cst = arith.constant dense<0.000000e+00> : vector<160x40xf32>
    %3 = tpu.matmul %1, %2, %cst {dimension_numbers = #tpu.dot_dimension_numbers<[1], [0], [0], [1], [0, 0, 1, 1], [], []>} : vector<160x64xf32>, vector<64x40xf32>, vector<160x40xf32> -> vector<160x40xf32>
    %4 = vector.extract_strided_slice %3 {offsets = [0, 0], sizes = [80, 40], strides = [1, 1]} : vector<160x40xf32> to vector<80x40xf32>
    %5 = vector.extract_strided_slice %3 {offsets = [80, 0], sizes = [80, 40], strides = [1, 1]} : vector<160x40xf32> to vector<80x40xf32>
    %c0_4 = arith.constant 0 : index
    %c0_5 = arith.constant 0 : index
    %c0_6 = arith.constant 0 : index
    %6 = vector.load %arg2[%c0_4, %c0_5, %c0_6] : memref<1x80x80xf32, #tpu.memory_space<vmem>>, vector<1x80x80xf32>
    %7 = vector.shape_cast %6 : vector<1x80x80xf32> to vector<80x80xf32>
    %c0_7 = arith.constant 0 : index
    %c0_8 = arith.constant 0 : index
    %c0_9 = arith.constant 0 : index
    %8 = vector.load %arg3[%c0_7, %c0_8, %c0_9] : memref<1x80x80xf32, #tpu.memory_space<vmem>>, vector<1x80x80xf32>
    %9 = vector.shape_cast %8 : vector<1x80x80xf32> to vector<80x80xf32>
    %c0_10 = arith.constant 0 : index
    %c0_11 = arith.constant 0 : index
    %10 = vector.load %arg4[%c0_10, %c0_11] : memref<80x1xf32, #tpu.memory_space<vmem>>, vector<80x1xf32>
    %c0_12 = arith.constant 0 : index
    %c0_13 = arith.constant 0 : index
    %11 = vector.load %arg6[%c0_12, %c0_13] : memref<1x40xf32, #tpu.memory_space<vmem>>, vector<1x40xf32>
    %cst_14 = arith.constant dense<0.000000e+00> : vector<80x40xf32>
    %12 = tpu.matmul %7, %4, %cst_14 {dimension_numbers = #tpu.dot_dimension_numbers<[1], [0], [0], [1], [0, 0, 1, 1], [], []>} : vector<80x80xf32>, vector<80x40xf32>, vector<80x40xf32> -> vector<80x40xf32>
    %13 = vector.broadcast %10 : vector<80x1xf32> to vector<80x40xf32>
    %14 = arith.mulf %13, %5 : vector<80x40xf32>
    %15 = arith.addf %12, %14 : vector<80x40xf32>
    %16 = vector.broadcast %11 : vector<1x40xf32> to vector<80x40xf32>
    %17 = arith.addf %15, %16 : vector<80x40xf32>
    %cst_15 = arith.constant dense<0.000000e+00> : vector<80x40xf32>
    %18 = tpu.matmul %9, %5, %cst_15 {dimension_numbers = #tpu.dot_dimension_numbers<[1], [0], [0], [1], [0, 0, 1, 1], [], []>} : vector<80x80xf32>, vector<80x40xf32>, vector<80x40xf32> -> vector<80x40xf32>
    %19 = vector.broadcast %10 : vector<80x1xf32> to vector<80x40xf32>
    %20 = arith.mulf %19, %4 : vector<80x40xf32>
    %21 = arith.addf %18, %20 : vector<80x40xf32>
    %22 = vector.broadcast %11 : vector<1x40xf32> to vector<80x40xf32>
    %23 = arith.addf %21, %22 : vector<80x40xf32>
    %cst_16 = arith.constant 0.000000e+00 : f32
    %24 = vector.broadcast %cst_16 : f32 to vector<80x40xf32>
    %25 = arith.minimumf %17, %24 : vector<80x40xf32>
    %26 = math.exp %25 : vector<80x40xf32>
    %cst_17 = arith.constant 1.000000e+00 : f32
    %27 = vector.broadcast %cst_17 : f32 to vector<80x40xf32>
    %28 = arith.subf %26, %27 : vector<80x40xf32>
    %cst_18 = arith.constant 1.67326319 : f32
    %29 = vector.broadcast %cst_18 : f32 to vector<80x40xf32>
    %30 = arith.mulf %29, %28 : vector<80x40xf32>
    %cst_19 = arith.constant 0.000000e+00 : f32
    %31 = vector.broadcast %cst_19 : f32 to vector<80x40xf32>
    %32 = arith.cmpf ogt, %17, %31 : vector<80x40xf32>
    %33 = arith.select %32, %17, %30 : vector<80x40xi1>, vector<80x40xf32>
    %cst_20 = arith.constant 1.05070102 : f32
    %34 = vector.broadcast %cst_20 : f32 to vector<80x40xf32>
    %35 = arith.mulf %34, %33 : vector<80x40xf32>
    %cst_21 = arith.constant 0.000000e+00 : f32
    %36 = vector.broadcast %cst_21 : f32 to vector<80x40xf32>
    %37 = arith.minimumf %23, %36 : vector<80x40xf32>
    %38 = math.exp %37 : vector<80x40xf32>
    %cst_22 = arith.constant 1.000000e+00 : f32
    %39 = vector.broadcast %cst_22 : f32 to vector<80x40xf32>
    %40 = arith.subf %38, %39 : vector<80x40xf32>
    %cst_23 = arith.constant 1.67326319 : f32
    %41 = vector.broadcast %cst_23 : f32 to vector<80x40xf32>
    %42 = arith.mulf %41, %40 : vector<80x40xf32>
    %cst_24 = arith.constant 0.000000e+00 : f32
    %43 = vector.broadcast %cst_24 : f32 to vector<80x40xf32>
    %44 = arith.cmpf ogt, %23, %43 : vector<80x40xf32>
    %45 = arith.select %44, %23, %42 : vector<80x40xi1>, vector<80x40xf32>
    %cst_25 = arith.constant 1.05070102 : f32
    %46 = vector.broadcast %cst_25 : f32 to vector<80x40xf32>
    %47 = arith.mulf %46, %45 : vector<80x40xf32>
    %c0_26 = arith.constant 0 : index
    %c0_27 = arith.constant 0 : index
    %48 = vector.load %arg7[%c0_26, %c0_27] : memref<40x80xf32, #tpu.memory_space<vmem>>, vector<40x80xf32>
    %c0_28 = arith.constant 0 : index
    %c0_29 = arith.constant 0 : index
    %49 = vector.load %arg8[%c0_28, %c0_29] : memref<40x20xf32, #tpu.memory_space<vmem>>, vector<40x20xf32>
    %cst_30 = arith.constant dense<0.000000e+00> : vector<40x40xf32>
    %50 = tpu.matmul %48, %35, %cst_30 {dimension_numbers = #tpu.dot_dimension_numbers<[1], [0], [0], [1], [0, 0, 1, 1], [], []>} : vector<40x80xf32>, vector<80x40xf32>, vector<40x40xf32> -> vector<40x40xf32>
    %cst_31 = arith.constant dense<0.000000e+00> : vector<40x20xf32>
    %51 = tpu.matmul %50, %49, %cst_31 {dimension_numbers = #tpu.dot_dimension_numbers<[1], [0], [0], [1], [0, 0, 1, 1], [], []>} : vector<40x40xf32>, vector<40x20xf32>, vector<40x20xf32> -> vector<40x20xf32>
    %cst_32 = arith.constant dense<0.000000e+00> : vector<40x40xf32>
    %52 = tpu.matmul %48, %47, %cst_32 {dimension_numbers = #tpu.dot_dimension_numbers<[1], [0], [0], [1], [0, 0, 1, 1], [], []>} : vector<40x80xf32>, vector<80x40xf32>, vector<40x40xf32> -> vector<40x40xf32>
    %cst_33 = arith.constant dense<0.000000e+00> : vector<40x20xf32>
    %53 = tpu.matmul %52, %49, %cst_33 {dimension_numbers = #tpu.dot_dimension_numbers<[1], [0], [0], [1], [0, 0, 1, 1], [], []>} : vector<40x40xf32>, vector<40x20xf32>, vector<40x20xf32> -> vector<40x20xf32>
    %cst_34 = arith.constant 2.500000e-01 : f32
    %54 = vector.broadcast %cst_34 : f32 to vector<40x20xf32>
    %55 = arith.mulf %54, %51 : vector<40x20xf32>
    %c0_35 = arith.constant 0 : index
    %c0_36 = arith.constant 0 : index
    %c0_37 = arith.constant 0 : index
    %56 = vector.load %arg9[%c0_35, %c0_36, %c0_37] : memref<1x80x20xf32, #tpu.memory_space<vmem>>, vector<1x40x20xf32>
    %57 = vector.shape_cast %56 : vector<1x40x20xf32> to vector<40x20xf32>
    %58 = vector.shape_cast %55 : vector<40x20xf32> to vector<1x40x20xf32>
    tpu.vector_store %arg9[%c0_35, %c0_36, %c0_37], %58 {strides = array<i32>} : memref<1x80x20xf32, #tpu.memory_space<vmem>>, vector<1x40x20xf32>,
    %cst_38 = arith.constant 2.500000e-01 : f32
    %59 = vector.broadcast %cst_38 : f32 to vector<40x20xf32>
    %60 = arith.mulf %59, %53 : vector<40x20xf32>
    %c0_39 = arith.constant 0 : index
    %c40 = arith.constant 40 : index
    %c0_40 = arith.constant 0 : index
    %61 = vector.load %arg9[%c0_39, %c40, %c0_40] : memref<1x80x20xf32, #tpu.memory_space<vmem>>, vector<1x40x20xf32>
    %62 = vector.shape_cast %61 : vector<1x40x20xf32> to vector<40x20xf32>
    %63 = vector.shape_cast %60 : vector<40x20xf32> to vector<1x40x20xf32>
    tpu.vector_store %arg9[%c0_39, %c40, %c0_40], %63 {strides = array<i32>} : memref<1x80x20xf32, #tpu.memory_space<vmem>>, vector<1x40x20xf32>,
    return
  }
  func.func @transform_0(%arg0: i32) -> (i32, i32, i32) {
    %c0_i32 = arith.constant 0 : i32
    %c0_i32_0 = arith.constant 0 : i32
    %c0_i32_1 = arith.constant 0 : i32
    return %arg0, %c0_i32, %c0_i32_0 : i32, i32, i32
  }
  func.func @transform_1(%arg0: i32) -> (i32, i32, i32) {
    %c0_i32 = arith.constant 0 : i32
    %c0_i32_0 = arith.constant 0 : i32
    %c0_i32_1 = arith.constant 0 : i32
    return %arg0, %c0_i32, %c0_i32_0 : i32, i32, i32
  }
  func.func @transform_2(%arg0: i32) -> (i32, i32, i32) {
    %c0_i32 = arith.constant 0 : i32
    %c0_i32_0 = arith.constant 0 : i32
    %c0_i32_1 = arith.constant 0 : i32
    return %arg0, %c0_i32, %c0_i32_0 : i32, i32, i32
  }
  func.func @transform_3(%arg0: i32) -> (i32, i32) {
    %c0_i32 = arith.constant 0 : i32
    %c0_i32_0 = arith.constant 0 : i32
    %c0_i32_1 = arith.constant 0 : i32
    return %c0_i32, %c0_i32_0 : i32, i32
  }
  func.func @transform_4(%arg0: i32) -> (i32, i32) {
    %c0_i32 = arith.constant 0 : i32
    %c0_i32_0 = arith.constant 0 : i32
    %c0_i32_1 = arith.constant 0 : i32
    return %c0_i32, %c0_i32_0 : i32, i32
  }
  func.func @transform_5(%arg0: i32) -> (i32, i32) {
    %c0_i32 = arith.constant 0 : i32
    %c0_i32_0 = arith.constant 0 : i32
    %c0_i32_1 = arith.constant 0 : i32
    return %c0_i32, %c0_i32_0 : i32, i32
  }
  func.func @transform_6(%arg0: i32) -> (i32, i32) {
    %c0_i32 = arith.constant 0 : i32
    %c0_i32_0 = arith.constant 0 : i32
    %c0_i32_1 = arith.constant 0 : i32
    return %c0_i32, %c0_i32_0 : i32, i32
  }
  func.func @transform_7(%arg0: i32) -> (i32, i32) {
    %c0_i32 = arith.constant 0 : i32
    %c0_i32_0 = arith.constant 0 : i32
    %c0_i32_1 = arith.constant 0 : i32
    return %c0_i32, %c0_i32_0 : i32, i32
  }
  func.func @transform_8(%arg0: i32) -> (i32, i32, i32) {
    %c0_i32 = arith.constant 0 : i32
    %c0_i32_0 = arith.constant 0 : i32
    %c0_i32_1 = arith.constant 0 : i32
    return %arg0, %c0_i32, %c0_i32_0 : i32, i32, i32
  }
}

module attributes {stable_mosaic.version = 11 : i64} {
  func.func @head_kernel(%arg0: memref<2x1600xf32, #tpu.memory_space<vmem>>, %arg1: memref<1600x128xf32, #tpu.memory_space<vmem>>, %arg2: memref<1x128xf32, #tpu.memory_space<vmem>>, %arg3: memref<2x1xf32, #tpu.memory_space<vmem>>, %arg4: memref<128x1xf32, #tpu.memory_space<vmem>>, %arg5: memref<1x1xf32, #tpu.memory_space<vmem>>, %arg6: memref<1x1xf32, #tpu.memory_space<vmem>>, %arg7: memref<2x1xf32, #tpu.memory_space<vmem>>) attributes {dimension_semantics = [], scalar_prefetch = 0 : i64, scratch_operands = 0 : i64, tpu.core_type = #tpu.core_type<tc>} {
    %c0 = arith.constant 0 : index
    %c0_0 = arith.constant 0 : index
    %0 = vector.load %arg0[%c0, %c0_0] : memref<2x1600xf32, #tpu.memory_space<vmem>>, vector<2x1600xf32>
    %c0_1 = arith.constant 0 : index
    %c0_2 = arith.constant 0 : index
    %1 = vector.load %arg1[%c0_1, %c0_2] : memref<1600x128xf32, #tpu.memory_space<vmem>>, vector<1600x128xf32>
    %cst = arith.constant dense<0.000000e+00> : vector<2x128xf32>
    %2 = tpu.matmul %0, %1, %cst {dimension_numbers = #tpu.dot_dimension_numbers<[1], [0], [0], [1], [0, 0, 1, 1], [], []>} : vector<2x1600xf32>, vector<1600x128xf32>, vector<2x128xf32> -> vector<2x128xf32>
    %c0_3 = arith.constant 0 : index
    %c0_4 = arith.constant 0 : index
    %3 = vector.load %arg2[%c0_3, %c0_4] : memref<1x128xf32, #tpu.memory_space<vmem>>, vector<1x128xf32>
    %4 = vector.broadcast %3 : vector<1x128xf32> to vector<2x128xf32>
    %5 = arith.addf %2, %4 : vector<2x128xf32>
    %cst_5 = arith.constant 0.000000e+00 : f32
    %6 = vector.broadcast %cst_5 : f32 to vector<2x128xf32>
    %7 = arith.maximumf %5, %6 : vector<2x128xf32>
    %c0_6 = arith.constant 0 : index
    %c0_7 = arith.constant 0 : index
    %8 = vector.load %arg4[%c0_6, %c0_7] : memref<128x1xf32, #tpu.memory_space<vmem>>, vector<128x1xf32>
    %cst_8 = arith.constant dense<0.000000e+00> : vector<2x1xf32>
    %9 = tpu.matmul %7, %8, %cst_8 {dimension_numbers = #tpu.dot_dimension_numbers<[1], [0], [0], [1], [0, 0, 1, 1], [], []>} : vector<2x128xf32>, vector<128x1xf32>, vector<2x1xf32> -> vector<2x1xf32>
    %c0_9 = arith.constant 0 : index
    %c0_10 = arith.constant 0 : index
    %10 = vector.load %arg3[%c0_9, %c0_10] : memref<2x1xf32, #tpu.memory_space<vmem>>, vector<2x1xf32>
    %c0_11 = arith.constant 0 : index
    %c0_12 = arith.constant 0 : index
    %11 = vector.load %arg5[%c0_11, %c0_12] : memref<1x1xf32, #tpu.memory_space<vmem>>, vector<1x1xf32>
    %12 = vector.broadcast %11 : vector<1x1xf32> to vector<2x1xf32>
    %13 = arith.mulf %10, %12 : vector<2x1xf32>
    %14 = arith.addf %9, %13 : vector<2x1xf32>
    %c0_13 = arith.constant 0 : index
    %c0_14 = arith.constant 0 : index
    %15 = vector.load %arg6[%c0_13, %c0_14] : memref<1x1xf32, #tpu.memory_space<vmem>>, vector<1x1xf32>
    %16 = vector.broadcast %15 : vector<1x1xf32> to vector<2x1xf32>
    %17 = arith.addf %14, %16 : vector<2x1xf32>
    %18 = arith.negf %17 : vector<2x1xf32>
    %19 = math.exp %18 : vector<2x1xf32>
    %cst_15 = arith.constant 1.000000e+00 : f32
    %20 = vector.broadcast %cst_15 : f32 to vector<2x1xf32>
    %21 = arith.addf %20, %19 : vector<2x1xf32>
    %22 = arith.divf %20, %21 : vector<2x1xf32>
    %c0_16 = arith.constant 0 : index
    %c0_17 = arith.constant 0 : index
    %23 = vector.load %arg7[%c0_16, %c0_17] : memref<2x1xf32, #tpu.memory_space<vmem>>, vector<2x1xf32>
    tpu.vector_store %arg7[%c0_16, %c0_17], %22 {strides = array<i32>} : memref<2x1xf32, #tpu.memory_space<vmem>>, vector<2x1xf32>,
    return
  }
}

</mosaic_0001>

<bundles_post_ra>
// kernel: gcn_general_l_w_forward.3
= control target key start
LH: loop header
LB: loop body
LE: loop exit
PB: predicated region body
PF: predicated region fallthrough
CT: control target
= control target key end

     0   :  { %v1459_v43 = vmov 1983009808   ;;  %v249_v45 = vlaneseq  ;;  %vm1461_vm0 = vmmov 0   ;;  %vm315_vm1 = vcmask 523264   ;;  %s2206_s1 = inlined_call_operand.vmem [shape: f32[1600,128], index: 1, kind: input, shape index: {}]   ;;  %s2207_s0 = inlined_call_operand.vmem [shape: f32[2,1600], index: 0, kind: input, shape index: {}]   ;;  %s2208_s4 = inlined_call_operand.vmem [shape: f32[128,1], index: 4, kind: input, shape index: {}]   ;;  %s2209_s5 = inlined_call_operand.<no memory space> [shape: f32[1,1], index: 5, kind: input, shape index: {}]   ;;  %s2210_s6 = inlined_call_operand.<no memory space> [shape: f32[1,1], index: 6, kind: input, shape index: {}]   ;;  %s2211_s2 = inlined_call_operand.vmem [shape: f32[1,128], index: 2, kind: input, shape index: {}]   ;;  %s2212_s3 = inlined_call_operand.vmem [shape: f32[2,1], index: 3, kind: input, shape index: {}]   ;;  %s2213_s7 = inlined_call_operand.vmem [shape: f32[2,1], index: 7, kind: output, shape index: {}]  }
   0x1   :  { %v50_v0 = vld [vmem:[%s2206_s1 + $0x80] sm:$0xff]  ;;  %v51_v1 = vld [vmem:[%s2206_s1 + $0x88] sm:$0xff]  ;;  %v52_v11 = vld [vmem:[%s2206_s1 + $0x90] sm:$0xff]  ;;  %v247_v44 = vunpack.c.l.s4 %v1459_v43  ;;  %vm918_vm2 = vcmask 1024  }
   0x2   :  { %v34_v2 = vld [vmem:[%s2206_s1] sm:$0xff]  ;;  %v1220_v3 = vpack.c.bf16 %v51_v1, %v50_v0  ;;  %v35_v4 = vld [vmem:[%s2206_s1 + $0x8] sm:$0xff]  ;;  %v53_v13 = vld [vmem:[%s2206_s1 + $0x98] sm:$0xff]  ;;  %v250_v60 = vshrl.u32 %v249_v45, 7 }
   0x3   :  { %v82_v5 = vld [vmem:[%s2206_s1 + $0x180] sm:$0xff]  ;;  %v83_v6 = vld [vmem:[%s2206_s1 + $0x188] sm:$0xff]  ;;  %v1222_v7 = vpack.c.bf16 %v35_v4, %v34_v2  ;;  %v36_v14 = vld [vmem:[%s2206_s1 + $0x10] sm:$0xff]  ;;  %v1224_v16 = vpack.c.bf16 %v53_v13, %v52_v11  ;;  %v248_v59 = vunpack.c.0.s8 %v247_v44 }
   0x4   :  { %v1252_v8 = vpack.c.bf16 %v83_v6, %v82_v5  ;;  %v66_v9 = vld [vmem:[%s2206_s1 + $0x100] sm:$0xff]  ;;  %v67_v10 = vld [vmem:[%s2206_s1 + $0x108] sm:$0xff]  ;;  %1221 = vmatprep.subr.bf16.mxu0 %v1220_v3  ;;  %v37_v15 = vld [vmem:[%s2206_s1 + $0x18] sm:$0xff] }
   0x5   :  { %v1254_v12 = vpack.c.bf16 %v67_v10, %v66_v9  ;;  %1223 = vmatpush3.bf16.msra.mxu0 %v1222_v7  ;;  %v1226_v17 = vpack.c.bf16 %v37_v15, %v36_v14  ;;  %v84_v18 = vld [vmem:[%s2206_s1 + $0x190] sm:$0xff]  ;;  %v85_v19 = vld [vmem:[%s2206_s1 + $0x198] sm:$0xff]  ;;  %v54_v23 = vld [vmem:[%s2206_s1 + $0xa0] sm:$0xff]  ;;  %v1647_v10 = vsub.s32 %v248_v59, %v250_v60 }
   0x6   :  { %1253 = vmatprep.subr.bf16.mxu1 %v1252_v8  ;;  %v68_v20 = vld [vmem:[%s2206_s1 + $0x110] sm:$0xff]  ;;  %v1256_v21 = vpack.c.bf16 %v85_v19, %v84_v18  ;;  %v69_v22 = vld [vmem:[%s2206_s1 + $0x118] sm:$0xff]  ;;  %v55_v24 = vld [vmem:[%s2206_s1 + $0xa8] sm:$0xff]  ;;  %1225 = vmatprep.subr.bf16.mxu0 %v1224_v16 }
   0x7   :  { %1255 = vmatpush3.bf16.msra.mxu1 %v1254_v12  ;;  %v1258_v25 = vpack.c.bf16 %v69_v22, %v68_v20  ;;  %v1228_v26 = vpack.c.bf16 %v55_v24, %v54_v23  ;;  %v38_v27 = vld [vmem:[%s2206_s1 + $0x20] sm:$0xff]  ;;  %v39_v28 = vld [vmem:[%s2206_s1 + $0x28] sm:$0xff]  ;;  %v56_v35 = vld [vmem:[%s2206_s1 + $0xb0] sm:$0xff] }
   0x8   :  { %v86_v29 = vld [vmem:[%s2206_s1 + $0x1a0] sm:$0xff]  ;;  %1257 = vmatprep.subr.bf16.mxu1 %v1256_v21  ;;  %v87_v30 = vld [vmem:[%s2206_s1 + $0x1a8] sm:$0xff]  ;;  %v1230_v33 = vpack.c.bf16 %v39_v28, %v38_v27  ;;  %v57_v36 = vld [vmem:[%s2206_s1 + $0xb8] sm:$0xff] }
   0x9   :  { %v70_v31 = vld [vmem:[%s2206_s1 + $0x120] sm:$0xff]  ;;  %v71_v32 = vld [vmem:[%s2206_s1 + $0x128] sm:$0xff]  ;;  %1227 = vmatpush3.bf16.msra.mxu0 %v1226_v17  ;;  %v1260_v34 = vpack.c.bf16 %v87_v30, %v86_v29  ;;  %v40_v37 = vld [vmem:[%s2206_s1 + $0x30] sm:$0xff]  ;;  %v1232_v39 = vpack.c.bf16 %v57_v36, %v56_v35 }
   0xa   :  { %1229 = vmatprep.subr.bf16.mxu0 %v1228_v26  ;;  %v1262_v38 = vpack.c.bf16 %v71_v32, %v70_v31  ;;  %v41_v40 = vld [vmem:[%s2206_s1 + $0x38] sm:$0xff]  ;;  %v88_v41 = vld [vmem:[%s2206_s1 + $0x1b0] sm:$0xff]  ;;  %v58_v49 = vld [vmem:[%s2206_s1 + $0xc0] sm:$0xff] }
   0xb   :  { %1259 = vmatpush3.bf16.msra.mxu1 %v1258_v25  ;;  %v89_v42 = vld [vmem:[%s2206_s1 + $0x1b8] sm:$0xff]  ;;  %v72_v47 = vld [vmem:[%s2206_s1 + $0x130] sm:$0xff]  ;;  %v59_v50 = vld [vmem:[%s2206_s1 + $0xc8] sm:$0xff]  ;;  %v1234_v51 = vpack.c.bf16 %v41_v40, %v40_v37 }
   0xc   :  { %1261 = vmatprep.subr.bf16.mxu1 %v1260_v34  ;;  %v1264_v46 = vpack.c.bf16 %v89_v42, %v88_v41  ;;  %v73_v48 = vld [vmem:[%s2206_s1 + $0x138] sm:$0xff]  ;;  %v90_v52 = vld [vmem:[%s2206_s1 + $0x1c0] sm:$0xff]  ;;  %v91_v53 = vld [vmem:[%s2206_s1 + $0x1c8] sm:$0xff]  ;;  %v1236_v55 = vpack.c.bf16 %v59_v50, %v58_v49 }
   0xd   :  { %1231 = vmatpush3.bf16.msra.mxu0 %v1230_v33  ;;  %v1266_v54 = vpack.c.bf16 %v73_v48, %v72_v47  ;;  %v42_v56 = vld [vmem:[%s2206_s1 + $0x40] sm:$0xff]  ;;  %v43_v57 = vld [vmem:[%s2206_s1 + $0x48] sm:$0xff]  ;;  %v1268_v61 = vpack.c.bf16 %v91_v53, %v90_v52  ;;  %v60_v63 = vld [vmem:[%s2206_s1 + $0xd0] sm:$0xff] }
   0xe   :  { %1233 = vmatprep.subr.bf16.mxu0 %v1232_v39  ;;  %v74_v58 = vld [vmem:[%s2206_s1 + $0x140] sm:$0xff]  ;;  %v75_v62 = vld [vmem:[%s2206_s1 + $0x148] sm:$0xff]  ;;  %v61_v0 = vld [vmem:[%s2206_s1 + $0xd8] sm:$0xff]  ;;  %v1238_v3 = vpack.c.bf16 %v43_v57, %v42_v56 }
   0xf   :  { %1263 = vmatpush3.bf16.msra.mxu1 %v1262_v38  ;;  %v92_v1 = vld [vmem:[%s2206_s1 + $0x1d0] sm:$0xff]  ;;  %v93_v2 = vld [vmem:[%s2206_s1 + $0x1d8] sm:$0xff]  ;;  %v1270_v5 = vpack.c.bf16 %v75_v62, %v74_v58  ;;  %v1240_v6 = vpack.c.bf16 %v61_v0, %v60_v63  ;;  %v62_v12 = vld [vmem:[%s2206_s1 + $0xe0] sm:$0xff] }
  0x10   :  { %1265 = vmatprep.subr.bf16.mxu1 %v1264_v46  ;;  %v44_v4 = vld [vmem:[%s2206_s1 + $0x50] sm:$0xff]  ;;  %v45_v7 = vld [vmem:[%s2206_s1 + $0x58] sm:$0xff]  ;;  %v1272_v11 = vpack.c.bf16 %v93_v2, %v92_v1  ;;  %v63_v13 = vld [vmem:[%s2206_s1 + $0xe8] sm:$0xff] }
  0x11   :  { %1235 = vmatpush3.bf16.msra.mxu0 %v1234_v51  ;;  %v76_v8 = vld [vmem:[%s2206_s1 + $0x150] sm:$0xff]  ;;  %v77_v9 = vld [vmem:[%s2206_s1 + $0x158] sm:$0xff]  ;;  %v94_v14 = vld [vmem:[%s2206_s1 + $0x1e0] sm:$0xff]  ;;  %v1242_v16 = vpack.c.bf16 %v45_v7, %v44_v4  ;;  %v1244_v19 = vpack.c.bf16 %v63_v13, %v62_v12 }
  0x12   :  { %1237 = vmatprep.subr.bf16.mxu0 %v1236_v55  ;;  %v95_v15 = vld [vmem:[%s2206_s1 + $0x1e8] sm:$0xff]  ;;  %v1274_v17 = vpack.c.bf16 %v77_v9, %v76_v8  ;;  %v30_v18 = vld [vmem:[%s2207_s0] sm:$0xff]  ;;  %v64_v27 = vld [vmem:[%s2206_s1 + $0xf0] sm:$0xff] }
  0x13   :  { %1267 = vmatpush3.bf16.msra.mxu1 %v1266_v54  ;;  %v46_v20 = vld [vmem:[%s2206_s1 + $0x60] sm:$0xff]  ;;  %v47_v21 = vld [vmem:[%s2206_s1 + $0x68] sm:$0xff]  ;;  %v252_v23 = vrot.slane %v30_v18, %v1647_v10  ;;  %v245_v24 = vcombine.high %v30_v18, %v30_v18  ;;  %v1276_v25 = vpack.c.bf16 %v95_v15, %v94_v14  ;;  %v65_v28 = vld [vmem:[%s2206_s1 + $0xf8] sm:$0xff] }
  0x14   :  { %1269 = vmatprep.subr.bf16.mxu1 %v1268_v61  ;;  %v78_v22 = vld [vmem:[%s2206_s1 + $0x160] sm:$0xff]  ;;  %v79_v26 = vld [vmem:[%s2206_s1 + $0x168] sm:$0xff]  ;;  %v96_v29 = vld [vmem:[%s2206_s1 + $0x1f0] sm:$0xff]  ;;  %v1246_v33 = vpack.c.bf16 %v47_v21, %v46_v20  ;;  %v1248_v35 = vpack.c.bf16 %v65_v28, %v64_v27 }
  0x15   :  { %1239 = vmatpush3.bf16.msra.mxu0 %v1238_v3  ;;  %v97_v30 = vld [vmem:[%s2206_s1 + $0x1f8] sm:$0xff]  ;;  %v260_v31 = vcombine.high %v252_v23, %v252_v23  ;;  %v259_v32 = vrot.slane %v245_v24, %v1647_v10  ;;  %v1278_v34 = vpack.c.bf16 %v79_v26, %v78_v22  ;;  %v48_v36 = vld [vmem:[%s2206_s1 + $0x70] sm:$0xff]  ;;  %v114_v42 = vld [vmem:[%s2206_s1 + $0x280] sm:$0xff] }
  0x16   :  { %1241 = vmatprep.subr.bf16.mxu0 %v1240_v6  ;;  %v49_v37 = vld [vmem:[%s2206_s1 + $0x78] sm:$0xff]  ;;  %v80_v38 = vld [vmem:[%s2206_s1 + $0x170] sm:$0xff]  ;;  %v1280_v40 = vpack.c.bf16 %v97_v30, %v96_v29  ;;  %v115_v43 = vld [vmem:[%s2206_s1 + $0x288] sm:$0xff] }
  0x17   :  { %1271 = vmatpush3.bf16.msra.mxu1 %v1270_v5  ;;  %v261_v39 = vcombine.high %v259_v32, %v259_v32  ;;  %382 = vmatprep.mubr.f32.mxu0 %v260_v31  ;;  %v81_v41 = vld [vmem:[%s2206_s1 + $0x178] sm:$0xff]  ;;  %v146_v44 = vld [vmem:[%s2206_s1 + $0x380] sm:$0xff]  ;;  %v147_v45 = vld [vmem:[%s2206_s1 + $0x388] sm:$0xff]  ;;  %v1250_v46 = vpack.c.bf16 %v49_v37, %v48_v36  ;;  %v1284_v48 = vpack.c.bf16 %v115_v43, %v114_v42 }
  0x18   :  { %1273 = vmatprep.subr.bf16.mxu1 %v1272_v11  ;;  %v1282_v47 = vpack.c.bf16 %v81_v41, %v80_v38  ;;  %v98_v49 = vld [vmem:[%s2206_s1 + $0x200] sm:$0xff]  ;;  %v99_v50 = vld [vmem:[%s2206_s1 + $0x208] sm:$0xff]  ;;  %v1316_v52 = vpack.c.bf16 %v147_v45, %v146_v44  ;;  %v116_v54 = vld [vmem:[%s2206_s1 + $0x290] sm:$0xff] }
  0x19   :  { %1243 = vmatpush3.bf16.msra.mxu0 %v1242_v16  ;;  %452 = vmatprep.mubr.f32.mxu1 %v261_v39  ;;  %v130_v51 = vld [vmem:[%s2206_s1 + $0x300] sm:$0xff]  ;;  %v131_v53 = vld [vmem:[%s2206_s1 + $0x308] sm:$0xff]  ;;  %v117_v55 = vld [vmem:[%s2206_s1 + $0x298] sm:$0xff]  ;;  %v1286_v58 = vpack.c.bf16 %v99_v50, %v98_v49 }
  0x1a   :  { %1245 = vmatprep.subr.bf16.mxu0 %v1244_v19  ;;  %v148_v56 = vld [vmem:[%s2206_s1 + $0x390] sm:$0xff]  ;;  %v149_v57 = vld [vmem:[%s2206_s1 + $0x398] sm:$0xff]  ;;  %v1318_v59 = vpack.c.bf16 %v131_v53, %v130_v51  ;;  %v1288_v60 = vpack.c.bf16 %v117_v55, %v116_v54  ;;  %v118_v2 = vld [vmem:[%s2206_s1 + $0x2a0] sm:$0xff] }
  0x1b   :  { %1275 = vmatpush3.bf16.msra.mxu1 %v1274_v17  ;;  %v100_v61 = vld [vmem:[%s2206_s1 + $0x210] sm:$0xff]  ;;  %v101_v62 = vld [vmem:[%s2206_s1 + $0x218] sm:$0xff]  ;;  %v1320_v0 = vpack.c.bf16 %v149_v57, %v148_v56  ;;  %v119_v3 = vld [vmem:[%s2206_s1 + $0x2a8] sm:$0xff] }
  0x1c   :  { %1277 = vmatprep.subr.bf16.mxu1 %v1276_v25  ;;  %v132_v63 = vld [vmem:[%s2206_s1 + $0x310] sm:$0xff]  ;;  %v133_v1 = vld [vmem:[%s2206_s1 + $0x318] sm:$0xff]  ;;  %v150_v4 = vld [vmem:[%s2206_s1 + $0x3a0] sm:$0xff]  ;;  %v1290_v6 = vpack.c.bf16 %v101_v62, %v100_v61  ;;  %v1292_v8 = vpack.c.bf16 %v119_v3, %v118_v2 }
  0x1d   :  { %1247 = vmatpush3.bf16.msra.mxu0 %v1246_v33  ;;  %v151_v5 = vld [vmem:[%s2206_s1 + $0x3a8] sm:$0xff]  ;;  %v1322_v7 = vpack.c.bf16 %v133_v1, %v132_v63  ;;  %v102_v9 = vld [vmem:[%s2206_s1 + $0x220] sm:$0xff]  ;;  %v120_v15 = vld [vmem:[%s2206_s1 + $0x2b0] sm:$0xff] }
  0x1e   :  { %1249 = vmatprep.subr.bf16.mxu0 %v1248_v35  ;;  %v103_v11 = vld [vmem:[%s2206_s1 + $0x228] sm:$0xff]  ;;  %v134_v12 = vld [vmem:[%s2206_s1 + $0x320] sm:$0xff]  ;;  %v1324_v13 = vpack.c.bf16 %v151_v5, %v150_v4  ;;  %v121_v16 = vld [vmem:[%s2206_s1 + $0x2b8] sm:$0xff] }
  0x1f   :  { %1279 = vmatpush3.bf16.msra.mxu1 %v1278_v34  ;;  %v135_v14 = vld [vmem:[%s2206_s1 + $0x328] sm:$0xff]  ;;  %v152_v17 = vld [vmem:[%s2206_s1 + $0x3b0] sm:$0xff]  ;;  %v153_v18 = vld [vmem:[%s2206_s1 + $0x3b8] sm:$0xff]  ;;  %v1294_v19 = vpack.c.bf16 %v103_v11, %v102_v9  ;;  %v1296_v22 = vpack.c.bf16 %v121_v16, %v120_v15 }
  0x20   :  { %1281 = vmatprep.subr.bf16.mxu1 %v1280_v40  ;;  %v104_v20 = vld [vmem:[%s2206_s1 + $0x230] sm:$0xff]  ;;  %v1326_v21 = vpack.c.bf16 %v135_v14, %v134_v12  ;;  %v137_v25 = vld [vmem:[%s2206_s1 + $0x338] sm:$0xff]  ;;  %v1328_v26 = vpack.c.bf16 %v153_v18, %v152_v17  ;;  %v122_v27 = vld [vmem:[%s2206_s1 + $0x2c0] sm:$0xff] }
  0x21   :  { %1251 = vmatpush3.bf16.msra.mxu0 %v1250_v46  ;;  %v136_v24 = vld [vmem:[%s2206_s1 + $0x330] sm:$0xff]  ;;  %v123_v28 = vld [vmem:[%s2206_s1 + $0x2c8] sm:$0xff]  ;;  %v154_v30 = vld [vmem:[%s2206_s1 + $0x3c0] sm:$0xff] }
  0x22   :  { %1285 = vmatprep.subr.bf16.mxu0 %v1284_v48  ;;  %v31_v29 = vld [vmem:[%s2207_s0 + $0x8] sm:$0xff]  ;;  %v1330_v35 = vpack.c.bf16 %v137_v25, %v136_v24  ;;  %v1300_v36 = vpack.c.bf16 %v123_v28, %v122_v27  ;;  %v106_v37 = vld [vmem:[%s2206_s1 + $0x240] sm:$0xff]  ;;  %v124_v44 = vld [vmem:[%s2206_s1 + $0x2d0] sm:$0xff] }
  0x23   :  { %1283 = vmatpush3.bf16.msra.mxu1 %v1282_v47  ;;  %v155_v31 = vld [vmem:[%s2206_s1 + $0x3c8] sm:$0xff]  ;;  %v262_v33 = vcombine.high %v31_v29, %v31_v29  ;;  %v138_v39 = vld [vmem:[%s2206_s1 + $0x340] sm:$0xff]  ;;  %v125_v45 = vld [vmem:[%s2206_s1 + $0x2d8] sm:$0xff] }
  0x24   :  { %1317 = vmatprep.subr.bf16.mxu1 %v1316_v52  ;;  %383 = vmatmul.mubr.f32.vlgmr.msra.gmra.mrb[0].mxu0 %v252_v23  ;;  %v105_v23 = vld [vmem:[%s2206_s1 + $0x238] sm:$0xff]  ;;  %v107_v38 = vld [vmem:[%s2206_s1 + $0x248] sm:$0xff]  ;;  %v1332_v42 = vpack.c.bf16 %v155_v31, %v154_v30  ;;  %v156_v46 = vld [vmem:[%s2206_s1 + $0x3d0] sm:$0xff]  ;;  %v1304_v51 = vpack.c.bf16 %v125_v45, %v124_v44 }
  0x25   :  { %1287 = vmatpush3.bf16.msra.mxu0 %v1286_v58  ;;  %v1298_v34 = vpack.c.bf16 %v105_v23, %v104_v20  ;;  %v1828_v41 = vrot.slane %v262_v33, %v1647_v10  ;;  %v139_v43 = vld [vmem:[%s2206_s1 + $0x348] sm:$0xff]  ;;  %v157_v47 = vld [vmem:[%s2206_s1 + $0x3d8] sm:$0xff]  ;;  %v1302_v49 = vpack.c.bf16 %v107_v38, %v106_v37  ;;  %v108_v52 = vld [vmem:[%s2206_s1 + $0x250] sm:$0xff] }
  0x26   :  { %453 = vmatmul.mubr.f32.vlgmr.msra.gmra.mrb[0].mxu1 %v259_v32  ;;  %1289 = vmatprep.subr.bf16.mxu0 %v1288_v60  ;;  %v1814_v32 = vrot.slane %v31_v29, %v1647_v10  ;;  %v1334_v50 = vpack.c.bf16 %v139_v43, %v138_v39  ;;  %v109_v53 = vld [vmem:[%s2206_s1 + $0x258] sm:$0xff]  ;;  %v140_v54 = vld [vmem:[%s2206_s1 + $0x350] sm:$0xff]  ;;  %v1336_v55 = vpack.c.bf16 %v157_v47, %v156_v46  ;;  %v126_v57 = vld [vmem:[%s2206_s1 + $0x2e0] sm:$0xff] }
  0x27   :  { %1319 = vmatpush3.bf16.msra.mxu1 %v1318_v59  ;;  %v278_v48 = vcombine.high %v1828_v41, %v1828_v41  ;;  %v141_v56 = vld [vmem:[%s2206_s1 + $0x358] sm:$0xff]  ;;  %v127_v58 = vld [vmem:[%s2206_s1 + $0x2e8] sm:$0xff]  ;;  %v158_v59 = vld [vmem:[%s2206_s1 + $0x3e0] sm:$0xff]  ;;  %v1306_v61 = vpack.c.bf16 %v109_v53, %v108_v52 }
  0x28   :  { %1321 = vmatprep.subr.bf16.mxu1 %v1320_v0  ;;  %v277_v40 = vcombine.high %v1814_v32, %v1814_v32  ;;  %v159_v60 = vld [vmem:[%s2206_s1 + $0x3e8] sm:$0xff]  ;;  %v1338_v62 = vpack.c.bf16 %v141_v56, %v140_v54  ;;  %v1308_v63 = vpack.c.bf16 %v127_v58, %v126_v57  ;;  %v110_v0 = vld [vmem:[%s2206_s1 + $0x260] sm:$0xff]  ;;  %v128_v5 = vld [vmem:[%s2206_s1 + $0x2f0] sm:$0xff] }
  0x29   :  { %1291 = vmatpush3.bf16.msra.mxu0 %v1290_v6  ;;  %592 = vmatprep.mubr.f32.mxu1 %v278_v48  ;;  %v111_v1 = vld [vmem:[%s2206_s1 + $0x268] sm:$0xff]  ;;  %v142_v2 = vld [vmem:[%s2206_s1 + $0x360] sm:$0xff]  ;;  %v1340_v3 = vpack.c.bf16 %v159_v60, %v158_v59  ;;  %v129_v6 = vld [vmem:[%s2206_s1 + $0x2f8] sm:$0xff] }
  0x2a   :  { %1293 = vmatprep.subr.bf16.mxu0 %v1292_v8  ;;  %522 = vmatprep.mubr.f32.mxu0 %v277_v40  ;;  %v143_v4 = vld [vmem:[%s2206_s1 + $0x368] sm:$0xff]  ;;  %v161_v8 = vld [vmem:[%s2206_s1 + $0x3f8] sm:$0xff]  ;;  %v1310_v9 = vpack.c.bf16 %v111_v1, %v110_v0  ;;  %v1312_v12 = vpack.c.bf16 %v129_v6, %v128_v5  ;;  %v144_v15 = vld [vmem:[%s2206_s1 + $0x370] sm:$0xff] }
  0x2b   :  { %1323 = vmatpush3.bf16.msra.mxu1 %v1322_v7  ;;  %v160_v7 = vld [vmem:[%s2206_s1 + $0x3f0] sm:$0xff]  ;;  %v1342_v11 = vpack.c.bf16 %v143_v4, %v142_v2  ;;  %v113_v14 = vld [vmem:[%s2206_s1 + $0x278] sm:$0xff]  ;;  %v178_v18 = vld [vmem:[%s2206_s1 + $0x480] sm:$0xff] }
  0x2c   :  { %1325 = vmatprep.subr.bf16.mxu1 %v1324_v13  ;;  %v112_v13 = vld [vmem:[%s2206_s1 + $0x270] sm:$0xff]  ;;  %v1344_v16 = vpack.c.bf16 %v161_v8, %v160_v7  ;;  %v145_v17 = vld [vmem:[%s2206_s1 + $0x378] sm:$0xff]  ;;  %v210_v20 = vld [vmem:[%s2206_s1 + $0x580] sm:$0xff] }
  0x2d   :  { %1295 = vmatpush3.bf16.msra.mxu0 %v1294_v19  ;;  %v179_v19 = vld [vmem:[%s2206_s1 + $0x488] sm:$0xff]  ;;  %v162_v23 = vld [vmem:[%s2206_s1 + $0x400] sm:$0xff]  ;;  %v1346_v24 = vpack.c.bf16 %v145_v17, %v144_v15  ;;  %v180_v30 = vld [vmem:[%s2206_s1 + $0x490] sm:$0xff] }
  0x2e   :  { %1297 = vmatprep.subr.bf16.mxu0 %v1296_v22  ;;  %v1314_v22 = vpack.c.bf16 %v113_v14, %v112_v13  ;;  %v1348_v25 = vpack.c.bf16 %v179_v19, %v178_v18  ;;  %v194_v27 = vld [vmem:[%s2206_s1 + $0x500] sm:$0xff]  ;;  %v195_v28 = vld [vmem:[%s2206_s1 + $0x508] sm:$0xff]  ;;  %v181_v31 = vld [vmem:[%s2206_s1 + $0x498] sm:$0xff] }
  0x2f   :  { %1327 = vmatpush3.bf16.msra.mxu1 %v1326_v21  ;;  %v211_v21 = vld [vmem:[%s2206_s1 + $0x588] sm:$0xff]  ;;  %v212_v33 = vld [vmem:[%s2206_s1 + $0x590] sm:$0xff]  ;;  %v1352_v38 = vpack.c.bf16 %v181_v31, %v180_v30  ;;  %v165_v40 = vld [vmem:[%s2206_s1 + $0x418] sm:$0xff] }
  0x30   :  { %1329 = vmatprep.subr.bf16.mxu1 %v1328_v26  ;;  %v163_v26 = vld [vmem:[%s2206_s1 + $0x408] sm:$0xff]  ;;  %v1380_v29 = vpack.c.bf16 %v211_v21, %v210_v20  ;;  %v32_v37 = vld [vmem:[%s2207_s0 + $0x10] sm:$0xff]  ;;  %v197_v46 = vld [vmem:[%s2206_s1 + $0x518] sm:$0xff] }
  0x31   :  { %1299 = vmatpush3.bf16.msra.mxu0 %v1298_v34  ;;  %v213_v34 = vld [vmem:[%s2206_s1 + $0x598] sm:$0xff]  ;;  %v164_v39 = vld [vmem:[%s2206_s1 + $0x410] sm:$0xff]  ;;  %v1956_v43 = vrot.slane %v32_v37, %v1647_v10  ;;  %v279_v44 = vcombine.high %v32_v37, %v32_v37  ;;  %v182_v47 = vld [vmem:[%s2206_s1 + $0x4a0] sm:$0xff] }
  0x32   :  { %1301 = vmatprep.subr.bf16.mxu0 %v1300_v36  ;;  %v1382_v36 = vpack.c.bf16 %v195_v28, %v194_v27  ;;  %v1384_v45 = vpack.c.bf16 %v213_v34, %v212_v33  ;;  %v183_v48 = vld [vmem:[%s2206_s1 + $0x4a8] sm:$0xff]  ;;  %v1354_v53 = vpack.c.bf16 %v165_v40, %v164_v39  ;;  %v184_v59 = vld [vmem:[%s2206_s1 + $0x4b0] sm:$0xff]  ;;  %v185_v60 = vld [vmem:[%s2206_s1 + $0x4b8] sm:$0xff] }
  0x33   :  { %1331 = vmatpush3.bf16.msra.mxu1 %v1330_v35  ;;  %v1350_v35 = vpack.c.bf16 %v163_v26, %v162_v23  ;;  %v1977_v52 = vrot.slane %v279_v44, %v1647_v10  ;;  %v1356_v54 = vpack.c.bf16 %v183_v48, %v182_v47  ;;  %v167_v56 = vld [vmem:[%s2206_s1 + $0x428] sm:$0xff]  ;;  %v198_v10 = vld [vmem:[%s2206_s1 + $0x520] sm:$0xff]  ;;  %v1360_v1 = vpack.c.bf16 %v185_v60, %v184_v59  ;;  %v168_v2 = vld [vmem:[%s2206_s1 + $0x430] sm:$0xff] }
  0x34   :  { %1333 = vmatprep.subr.bf16.mxu1 %v1332_v42  ;;  %v196_v42 = vld [vmem:[%s2206_s1 + $0x510] sm:$0xff]  ;;  %v199_v58 = vld [vmem:[%s2206_s1 + $0x528] sm:$0xff]  ;;  %v201_v6 = vld [vmem:[%s2206_s1 + $0x538] sm:$0xff] }
  0x35   :  { %1303 = vmatpush3.bf16.msra.mxu0 %v1302_v49  ;;  %v214_v49 = vld [vmem:[%s2206_s1 + $0x5a0] sm:$0xff]  ;;  %v1390_v0 = vpack.c.bf16 %v199_v58, %v198_v10  ;;  %v200_v4 = vld [vmem:[%s2206_s1 + $0x530] sm:$0xff]  ;;  %v187_v8 = vld [vmem:[%s2206_s1 + $0x4c8] sm:$0xff] }
  0x36   :  { %1305 = vmatprep.subr.bf16.mxu0 %v1304_v51  ;;  %v294_v51 = vcombine.high %v1956_v43, %v1956_v43  ;;  %v186_v7 = vld [vmem:[%s2206_s1 + $0x4c0] sm:$0xff]  ;;  %v1394_v13 = vpack.c.bf16 %v201_v6, %v200_v4  ;;  %v203_v19 = vld [vmem:[%s2206_s1 + $0x548] sm:$0xff]  ;;  %v188_v20 = vld [vmem:[%s2206_s1 + $0x4d0] sm:$0xff]  ;;  %v1462_v4 = vmov 0.0  }
  0x37   :  { %1335 = vmatpush3.bf16.msra.mxu1 %v1334_v50  ;;  %v215_v50 = vld [vmem:[%s2206_s1 + $0x5a8] sm:$0xff]  ;;  %v1364_v14 = vpack.c.bf16 %v187_v8, %v186_v7  ;;  %v170_v15 = vld [vmem:[%s2206_s1 + $0x440] sm:$0xff]  ;;  %v189_v21 = vld [vmem:[%s2206_s1 + $0x4d8] sm:$0xff] }
  0x38   :  { %1337 = vmatprep.subr.bf16.mxu1 %v1336_v55  ;;  %v166_v55 = vld [vmem:[%s2206_s1 + $0x420] sm:$0xff]  ;;  %v1388_v57 = vpack.c.bf16 %v215_v50, %v214_v49  ;;  %v221_v23 = vld [vmem:[%s2206_s1 + $0x5d8] sm:$0xff]  ;;  %v1368_v26 = vpack.c.bf16 %v189_v21, %v188_v20  ;;  %v172_v27 = vld [vmem:[%s2206_s1 + $0x450] sm:$0xff] }
  0x39   :  { %1307 = vmatpush3.bf16.msra.mxu0 %v1306_v61  ;;  %v216_v61 = vld [vmem:[%s2206_s1 + $0x5b0] sm:$0xff]  ;;  %v202_v17 = vld [vmem:[%s2206_s1 + $0x540] sm:$0xff]  ;;  %v173_v28 = vld [vmem:[%s2206_s1 + $0x458] sm:$0xff] }
  0x3a   :  { %1309 = vmatprep.subr.bf16.mxu0 %v1308_v63  ;;  %v1358_v63 = vpack.c.bf16 %v167_v56, %v166_v55  ;;  %v205_v31 = vld [vmem:[%s2206_s1 + $0x558] sm:$0xff]  ;;  %v190_v33 = vld [vmem:[%s2206_s1 + $0x4e0] sm:$0xff]  ;;  %v191_v34 = vld [vmem:[%s2206_s1 + $0x4e8] sm:$0xff]  ;;  %v1370_v37 = vpack.c.bf16 %v173_v28, %v172_v27 }
  0x3b   :  { %1339 = vmatpush3.bf16.msra.mxu1 %v1338_v62  ;;  %v217_v62 = vld [vmem:[%s2206_s1 + $0x5b8] sm:$0xff]  ;;  %v1372_v39 = vpack.c.bf16 %v191_v34, %v190_v33  ;;  %v174_v40 = vld [vmem:[%s2206_s1 + $0x460] sm:$0xff]  ;;  %v192_v47 = vld [vmem:[%s2206_s1 + $0x4f0] sm:$0xff]  ;;  %v12_v34 = vstv %s2209_s5 }
  0x3c   :  { %1341 = vmatprep.subr.bf16.mxu1 %v1340_v3  ;;  %v169_v3 = vld [vmem:[%s2206_s1 + $0x438] sm:$0xff]  ;;  %v1392_v5 = vpack.c.bf16 %v217_v62, %v216_v61  ;;  %v206_v44 = vld [vmem:[%s2206_s1 + $0x560] sm:$0xff]  ;;  %v224_v49 = vld [vmem:[%s2206_s1 + $0x5f0] sm:$0xff]  ;;  %v1460_v62 = vmov 0.0|0.0   ;;  %13 = vst [vmem:[#allocation2] sm:$0x1] %v12_v34 }
  0x3d   :  { %1311 = vmatpush3.bf16.msra.mxu0 %v1310_v9  ;;  %v218_v9 = vld [vmem:[%s2206_s1 + $0x5c0] sm:$0xff]  ;;  %v193_v48 = vld [vmem:[%s2206_s1 + $0x4f8] sm:$0xff]  ;;  %v208_v10 = vld [vmem:[%s2206_s1 + $0x570] sm:$0xff] }
  0x3e   :  { %1313 = vmatprep.subr.bf16.mxu0 %v1312_v12  ;;  %v1362_v12 = vpack.c.bf16 %v169_v3, %v168_v2  ;;  %v225_v50 = vld [vmem:[%s2206_s1 + $0x5f8] sm:$0xff]  ;;  %v226_v59 = vld [vmem:[%s2206_s1 + $0x600] sm:$0xff]  ;;  %v227_v60 = vld [vmem:[%s2206_s1 + $0x608] sm:$0xff] }
  0x3f   :  { %1343 = vmatpush3.bf16.msra.mxu1 %v1342_v11  ;;  %v219_v11 = vld [vmem:[%s2206_s1 + $0x5c8] sm:$0xff]  ;;  %v177_v55 = vld [vmem:[%s2206_s1 + $0x478] sm:$0xff]  ;;  %v1408_v56 = vpack.c.bf16 %v225_v50, %v224_v49  ;;  %v1413_v61 = vpack.c.bf16 %v227_v60, %v226_v59  ;;  %v230_v2 = vld [vmem:[%s2206_s1 + $0x620] sm:$0xff] }
  0x40   :  { %1345 = vmatprep.subr.bf16.mxu1 %v1344_v16  ;;  %v171_v16 = vld [vmem:[%s2206_s1 + $0x448] sm:$0xff]  ;;  %v1396_v18 = vpack.c.bf16 %v219_v11, %v218_v9  ;;  %v925_v7 = vld.sshfl [vmem:[%s2207_s0 + $0x18] sm:$0x3 pattern:$0x76325410]  ;;  %v809_v8 = vld [vmem:[%s2208_s4] sm:$0xff] }
  0x41   :  { %1315 = vmatpush3.bf16.msra.mxu0 %v1314_v22  ;;  %v220_v22 = vld [vmem:[%s2206_s1 + $0x5d0] sm:$0xff]  ;;  %v231_v3 = vld [vmem:[%s2206_s1 + $0x628] sm:$0xff]  ;;  %v817_v21 = vld [vmem:[%s2208_s4 + $0x40] sm:$0xff] }
  0x42   :  { %1349 = vmatprep.subr.bf16.mxu0 %v1348_v25  ;;  %v1398_v25 = vpack.c.bf16 %v203_v19, %v202_v17  ;;  %v1400_v30 = vpack.c.bf16 %v221_v23, %v220_v22  ;;  %v810_v9 = vld [vmem:[%s2208_s4 + $0x8] sm:$0xff]  ;;  %v811_v11 = vld [vmem:[%s2208_s4 + $0x10] sm:$0xff]  ;;  %v816_v19 = vld [vmem:[%s2208_s4 + $0x38] sm:$0xff] }
  0x43   :  { %1347 = vmatpush3.bf16.msra.mxu1 %v1346_v24  ;;  %v1366_v24 = vpack.c.bf16 %v171_v16, %v170_v15  ;;  %v813_v15 = vld [vmem:[%s2208_s4 + $0x20] sm:$0xff]  ;;  %v814_v16 = vld [vmem:[%s2208_s4 + $0x28] sm:$0xff] }
  0x44   :  { %1381 = vmatprep.subr.bf16.mxu1 %v1380_v29  ;;  %523 = vmatmul.mubr.f32.vlgmr.msra.gmra.mrb[2].mxu0 %v1814_v32  ;;  %v1386_v32 = vpack.c.bf16 %v197_v46, %v196_v42  ;;  %v204_v29 = vld [vmem:[%s2206_s1 + $0x550] sm:$0xff]  ;;  %v175_v42 = vld [vmem:[%s2206_s1 + $0x468] sm:$0xff]  ;;  %v1431_v17 = vpack.c.bf16 %v814_v16, %v813_v15  ;;  %v821_v27 = vld [vmem:[%s2208_s4 + $0x60] sm:$0xff] }
  0x45   :  { %1351 = vmatpush3.bf16.msra.mxu0 %v1350_v35  ;;  %662 = vmatprep.mubr.f32.mxu0 %v294_v51  ;;  %v222_v35 = vld [vmem:[%s2206_s1 + $0x5e0] sm:$0xff]  ;;  %v207_v46 = vld [vmem:[%s2206_s1 + $0x568] sm:$0xff]  ;;  %v1374_v51 = vpack.c.bf16 %v175_v42, %v174_v40 }
  0x46   :  { %593 = vmatmul.mubr.f32.vlgmr.msra.gmra.mrb[2].mxu1 %v1828_v41  ;;  %1353 = vmatprep.subr.bf16.mxu0 %v1352_v38  ;;  %v295_v41 = vcombine.high %v1977_v52, %v1977_v52  ;;  %v1402_v38 = vpack.c.bf16 %v205_v31, %v204_v29  ;;  %v818_v22 = vld [vmem:[%s2208_s4 + $0x48] sm:$0xff]  ;;  %v824_v31 = vld [vmem:[%s2208_s4 + $0x78] sm:$0xff] }
  0x47   :  { %1383 = vmatpush3.bf16.msra.mxu1 %v1382_v36  ;;  %v223_v36 = vld [vmem:[%s2206_s1 + $0x5e8] sm:$0xff]  ;;  %v1437_v23 = vpack.c.bf16 %v818_v22, %v817_v21 }
  0x48   :  { %1385 = vmatprep.subr.bf16.mxu1 %v1384_v45  ;;  %732 = vmatprep.mubr.f32.mxu1 %v295_v41  ;;  %v1404_v45 = vpack.c.bf16 %v223_v36, %v222_v35  ;;  %v209_v41 = vld [vmem:[%s2206_s1 + $0x578] sm:$0xff]  ;;  %v822_v28 = vld [vmem:[%s2208_s4 + $0x68] sm:$0xff]  ;;  %v14_v35 = vstv %s2210_s6 }
  0x49   :  { %1355 = vmatpush3.bf16.msra.mxu0 %v1354_v53  ;;  %v1406_v53 = vpack.c.bf16 %v207_v46, %v206_v44  ;;  %v1410_v58 = vpack.c.bf16 %v209_v41, %v208_v10  ;;  %v1443_v29 = vpack.c.bf16 %v822_v28, %v821_v27  ;;  %15 = vst [vmem:[#allocation3] sm:$0x1] %v14_v35 }
  0x4a   :  { %1357 = vmatprep.subr.bf16.mxu0 %v1356_v54  ;;  %v176_v54 = vld [vmem:[%s2206_s1 + $0x470] sm:$0xff] }
  0x4b   :  { %1387 = vmatpush3.bf16.msra.mxu1 %v1386_v32  ;;  %v1376_v32 = vpack.c.bf16 %v193_v48, %v192_v47 }
  0x4c   :  { %1389 = vmatprep.subr.bf16.mxu1 %v1388_v57  ;;  %v1378_v57 = vpack.c.bf16 %v177_v55, %v176_v54 }
  0x4d   :  { %1359 = vmatpush3.bf16.msra.mxu0 %v1358_v63  ;;  %v228_v63 = vld [vmem:[%s2206_s1 + $0x610] sm:$0xff] }
  0x4e   :  { %1361 = vmatprep.subr.bf16.mxu0 %v1360_v1 }
  0x4f   :  { %1391 = vmatpush3.bf16.msra.mxu1 %v1390_v0  ;;  %v229_v0 = vld [vmem:[%s2206_s1 + $0x618] sm:$0xff] }
  0x50   :  { %1393 = vmatprep.subr.bf16.mxu1 %v1392_v5  ;;  %v1416_v1 = vpack.c.bf16 %v229_v0, %v228_v63  ;;  %v1419_v5 = vpack.c.bf16 %v231_v3, %v230_v2  ;;  %v927_v2 = vld [vmem:[#allocation2] ss:$0 sm:$0xff] }
  0x51   :  { %1363 = vmatpush3.bf16.msra.mxu0 %v1362_v12  ;;  %v1425_v12 = vpack.c.bf16 %v810_v9, %v809_v8 }
  0x52   :  { %1365 = vmatprep.subr.bf16.mxu0 %v1364_v14 }
  0x53   :  { %1395 = vmatpush3.bf16.msra.mxu1 %v1394_v13  ;;  %v812_v13 = vld [vmem:[%s2208_s4 + $0x18] sm:$0xff] }
  0x54   :  { %1397 = vmatprep.subr.bf16.mxu1 %v1396_v18  ;;  %v1428_v14 = vpack.c.bf16 %v812_v13, %v811_v11  ;;  %v815_v18 = vld [vmem:[%s2208_s4 + $0x30] sm:$0xff] }
  0x55   :  { %1367 = vmatpush3.bf16.msra.mxu0 %v1366_v24  ;;  %v1434_v20 = vpack.c.bf16 %v816_v19, %v815_v18  ;;  %v819_v24 = vld [vmem:[%s2208_s4 + $0x50] sm:$0xff] }
  0x56   :  { %1369 = vmatprep.subr.bf16.mxu0 %v1368_v26 }
  0x57   :  { %1399 = vmatpush3.bf16.msra.mxu1 %v1398_v25  ;;  %v820_v25 = vld [vmem:[%s2208_s4 + $0x58] sm:$0xff] }
  0x58   :  { %1401 = vmatprep.subr.bf16.mxu1 %v1400_v30  ;;  %v1440_v26 = vpack.c.bf16 %v820_v25, %v819_v24  ;;  %v823_v30 = vld [vmem:[%s2208_s4 + $0x70] sm:$0xff] }
  0x59   :  { %1371 = vmatpush3.bf16.msra.mxu0 %v1370_v37  ;;  %v1446_v33 = vpack.c.bf16 %v824_v31, %v823_v30  ;;  %v924_v37 = vld [vmem:[%s2211_s2] ss:$0 sm:$0xff] }
  0x5a   :  { %1373 = vmatprep.subr.bf16.mxu0 %v1372_v39 }
  0x5b   :  { %1403 = vmatpush3.bf16.msra.mxu1 %v1402_v38 }
  0x5c   :  { %1405 = vmatprep.subr.bf16.mxu1 %v1404_v45 }
  0x5d   :  { %1375 = vmatpush3.bf16.msra.mxu0 %v1374_v51 }
  0x5e   :  { %1377 = vmatprep.subr.bf16.mxu0 %v1376_v32 }
  0x5f   :  { %1407 = vmatpush3.bf16.msra.mxu1 %v1406_v53 }
  0x60   :  { %1409 = vmatprep.subr.bf16.mxu1 %v1408_v56 }
  0x61   :  { %1379 = vmatpush3.bf16.msra.mxu0 %v1378_v57 }
  0x62   :  { %1412 = vmatprep.subr.bf16.mxu0 %v1460_v62 }
  0x63   :  { %1411 = vmatpush3.bf16.msra.mxu1 %v1410_v58 }
  0x64   :  { %1424 = vmatprep.subr.bf16.mxu1 %v1460_v62  ;;  %663 = vmatmul.mubr.f32.vlgmr.msra.gmra.mrb[4].mxu0 %v1956_v43  ;;  %v232_v43 = vld [vmem:[%s2206_s1 + $0x630] sm:$0xff] }
  0x65   :  { %1414 = vmatpush3.bf16.msra.mxu0 %v1413_v61  ;;  %1182 = vmatprep.mubr.msk.f32.mxu0 %vm1461_vm0, %v1462_v4 }
  0x66   :  { %733 = vmatmul.mubr.f32.vlgmr.msra.gmra.mrb[4].mxu1 %v1977_v52  ;;  %1415 = vmatprep.subr.bf16.mxu0 %v1460_v62  ;;  %v233_v52 = vld [vmem:[%s2206_s1 + $0x638] sm:$0xff] }
  0x67   :  { %1217 = vmatprep.mubr.msk.f32.mxu1 %vm1461_vm0, %v1462_v4  ;;  %v1422_v6 = vpack.c.bf16 %v233_v52, %v232_v43  ;;  %1426 = vmatpush3.bf16.msra.mxu1 %v1425_v12 }
  0x68   :  { %1427 = vmatprep.subr.bf16.mxu1 %v1460_v62 }
  0x69   :  { %1417 = vmatpush3.bf16.msra.mxu0 %v1416_v1  ;;  %v825_v1 = vld [vmem:[%s2212_s3] sm:$0x3] }
  0x6a   :  { %1418 = vmatprep.subr.bf16.mxu0 %v1460_v62  ;;  %v833_v3 = vmul.f32 %v927_v2, %v825_v1 }
  0x6b   :  { %1429 = vmatpush3.bf16.msra.mxu1 %v1428_v14 }
  0x6c   :  { %1430 = vmatprep.subr.bf16.mxu1 %v1460_v62 }
  0x6d   :  { %1420 = vmatpush3.bf16.msra.mxu0 %v1419_v5  ;;  %v928_v5 = vld [vmem:[#allocation3] ss:$0 sm:$0xff] }
  0x6e   :  { %1421 = vmatprep.subr.bf16.mxu0 %v1460_v62 }
  0x6f   :  { %1432 = vmatpush3.bf16.msra.mxu1 %v1431_v17 }
  0x70   :  { %1433 = vmatprep.subr.bf16.mxu1 %v1460_v62 }
  0x71   :  { %1423 = vmatpush3.bf16.msra.mxu0 %v1422_v6 }
  0x73   :  { %1435 = vmatpush3.bf16.msra.mxu1 %v1434_v20 }
  0x74   :  { %1183 = vmatmul.mubr.msk.f32.vlgmr.msra.gmra.mrb[6].mxu0 %vm315_vm1, %v925_v7  ;;  %1436 = vmatprep.subr.bf16.mxu1 %v1460_v62 }
  0x77   :  { %1438 = vmatpush3.bf16.msra.mxu1 %v1437_v23 }
  0x78   :  { %1439 = vmatprep.subr.bf16.mxu1 %v1460_v62 }
  0x7b   :  { %1441 = vmatpush3.bf16.msra.mxu1 %v1440_v26 }
  0x7c   :  { %1442 = vmatprep.subr.bf16.mxu1 %v1460_v62 }
  0x7f   :  { %1444 = vmatpush3.bf16.msra.mxu1 %v1443_v29 }
  0x80   :  { %1445 = vmatprep.subr.bf16.mxu1 %v1460_v62 }
  0x83   :  { %1447 = vmatpush3.bf16.msra.mxu1 %v1446_v33 }
  0xf7   :  { %v962_v36 = vpop.f32.mrb[0].mxu0 }
  0xf8   :  { %v963_v38 = vpop.f32.mrb[1].mxu0 }
  0xf9   :  { %v997_v39 = vpop.f32.mrb[0].mxu1  ;;  %v964_v40 = vadd.f32 %v963_v38, %v962_v36 }
  0xfa   :  { %v998_v42 = vpop.f32.mrb[1].mxu1 }
  0xfb   :  { %v999_v44 = vadd.f32 %v998_v42, %v997_v39  ;;  %v385_v45 = vadd.f32 %v964_v40, %v924_v37 }
  0xfd   :  { %v455_v46 = vadd.f32 %v999_v44, %v385_v45 }
 0x117   :  { %v1032_v47 = vpop.f32.mrb[2].mxu0 }
 0x118   :  { %v1033_v48 = vpop.f32.mrb[3].mxu0 }
 0x119   :  { %v1067_v49 = vpop.f32.mrb[2].mxu1  ;;  %v1034_v50 = vadd.f32 %v1033_v48, %v1032_v47 }
 0x11a   :  { %v1068_v51 = vpop.f32.mrb[3].mxu1 }
 0x11b   :  { %v1069_v53 = vadd.f32 %v1068_v51, %v1067_v49  ;;  %v525_v32 = vadd.f32 %v1034_v50, %v455_v46 }
 0x11d   :  { %v595_v54 = vadd.f32 %v1069_v53, %v525_v32 }
 0x137   :  { %v1102_v55 = vpop.f32.mrb[4].mxu0 }
 0x138   :  { %v1103_v56 = vpop.f32.mrb[5].mxu0 }
 0x139   :  { %v1137_v10 = vpop.f32.mrb[4].mxu1  ;;  %v1104_v41 = vadd.f32 %v1103_v56, %v1102_v55 }
 0x13a   :  { %v1138_v57 = vpop.f32.mrb[5].mxu1 }
 0x13b   :  { %v1139_v58 = vadd.f32 %v1138_v57, %v1137_v10  ;;  %v665_v59 = vadd.f32 %v1104_v41, %v595_v54 }
 0x13d   :  { %v735_v60 = vadd.f32 %v1139_v58, %v665_v59 }
 0x147   :  { %v804_v61 = vpop.f32.mrb[6].mxu0 }
 0x148   :  { %v805_v62 = vadd.f32 %v804_v61, %v735_v60  ;;  %v1184_v63 = vpop.f32.mrb[7].mxu0 }
 0x14a   :  { %v808_v0 = vmax.f32 %v805_v62, 0.0 }
 0x14c   :  { %1218 = vmatmul.mubr.f32.vlgmr.msra.gmra.mrb[6].mxu1 %v808_v0 }
 0x21f   :  { %v900_v4 = vpop.f32.mrb[6].mxu1 }
 0x220   :  { %v901_v43 = vadd.f32 %v900_v4, %v833_v3  ;;  %v1219_v52 = vpop.f32.mrb[7].mxu1 }
 0x222   :  { %v911_v6 = vadd.f32 %v928_v5, %v901_v43 }
 0x224   :  { %v929_v7 = vmul.f32 -1.442695, %v911_v6 }
 0x226   :  { %1455 = vpow2.f32 %v929_v7 }
 0x230   :  { %v1456_v8 = vpop.eup %1455 }
 0x231   :  { %v915_v9 = vadd.f32 1.0, %v1456_v8 }
 0x233   :  { %1457 = vrcp.f32 %v915_v9 }
 0x23d   :  { %v1458_v11 = vpop.eup %1457 }
 0x23e   :  { %919 = vst.msk [vmem:[%s2213_s7] sm:$0x3] %vm918_vm2, %v1458_v11 }

// kernel: gcn_general_l_w_forward.2
= control target key start
LH: loop header
LB: loop body
LE: loop exit
PB: predicated region body
PF: predicated region fallthrough
CT: control target
= control target key end

     0   :  { %s2351_s27 = smov 0   ;;  %s2924_s0 = inlined_call_operand.vmem [shape: f32[2,160,64], index: 0, kind: input, shape index: {}]   ;;  %s2925_s1 = inlined_call_operand.vmem [shape: f32[2,80,80], index: 1, kind: input, shape index: {}]   ;;  %s2926_s2 = inlined_call_operand.vmem [shape: f32[2,80,80], index: 2, kind: input, shape index: {}]   ;;  %s2927_s3 = inlined_call_operand.vmem [shape: f32[80,1], index: 3, kind: input, shape index: {}]   ;;  %s2928_s4 = inlined_call_operand.vmem [shape: f32[64,40], index: 4, kind: input, shape index: {}]   ;;  %s2929_s5 = inlined_call_operand.vmem [shape: f32[1,40], index: 5, kind: input, shape index: {}]   ;;  %s2930_s6 = inlined_call_operand.vmem [shape: f32[40,80], index: 6, kind: input, shape index: {}]   ;;  %s2931_s7 = inlined_call_operand.vmem [shape: f32[40,20], index: 7, kind: input, shape index: {}]   ;;  %s2932_s8 = inlined_call_operand.vmem [shape: f32[2,80,20], index: 8, kind: output, shape index: {}]  }
   0x1 LB: > { %s1694_s28 = sadd.s32 4294967295, %s2300_s27   ;;  %p1698_p0 = scmp.ge.s32.totalorder %s2300_s27, 1  ;;  %s2300_s27 = sphi %s2351_s27, %s18_s27  }
   0x2   : > { %p282_p1 = scmp.lt.s32.totalorder %s2300_s27, 3 }
   0x4   : > { %p283_p2 = pnand %p1698_p0, %p282_p1 }
   0x5   : > { %v366_v0 = vld [vmem:[%s2928_s4] sm:$0xff] (!%p283_p2)  ;;  %v367_v1 = vld [vmem:[%s2928_s4 + $0x8] sm:$0xff] (!%p283_p2)  ;;  %v368_v2 = vld [vmem:[%s2928_s4 + $0x10] sm:$0xff] (!%p283_p2)  ;;  %p326_p3 = scmp.lt.s32.totalorder (!%p283_p2), %s1694_s28, 1  ;;  %v2302_v5 = vmov (!%p283_p2), 0   ;;  %vm374_vm0 = vcmask (!%p283_p2), 523264  }
   0x6   : > { %286 = sbr.rel (%p283_p2) target bundleno = 995 (0x3e3), region = 52  ;;  %v2140_v3 = vpack.c.bf16 (!%p283_p2), %v367_v1, %v366_v0  ;;  %v369_v4 = vld [vmem:[%s2928_s4 + $0x18] sm:$0xff] (!%p283_p2)  ;;  %2252 = vset.pattern.permute.xlu0 (!%p283_p2), %v2302_v5  ;;  %2253 = vset.pattern.permute.xlu1 (!%p283_p2), %v2302_v5  ;;  %v370_v7 = vld [vmem:[%s2928_s4 + $0x20] sm:$0xff] (!%p283_p2)  ;;  %v371_v8 = vld [vmem:[%s2928_s4 + $0x28] sm:$0xff] (!%p283_p2)  ;;  %vm691_vm1 = vcmask (!%p283_p2), 654336   ;;  %vm2304_vm2 = vmmov (!%p283_p2), 0  }
   0x7   : > { %v2144_v6 = vpack.c.bf16 (!%p283_p2), %v369_v4, %v368_v2  ;;  %v620_v9 = vld [vmem:[%s2927_s3] sm:$0xff] (!%p283_p2)  ;;  %v622_v10 = vld [vmem:[%s2927_s3 + $0x10] sm:$0xff] (!%p283_p2)  ;;  %v621_v11 = vld [vmem:[%s2927_s3 + $0x8] sm:$0xff] (!%p283_p2)  ;;  %v2148_v12 = vpack.c.bf16 (!%p283_p2), %v371_v8, %v370_v7 }
   0x8   : > { %2141 = vmatprep.subr.bf16.mxu0 (!%p283_p2), %v2140_v3  ;;  %633 = vperm.xlu0 (!%p283_p2), %2252, %v620_v9   ;;  %v372_v13 = vld [vmem:[%s2928_s4 + $0x30] sm:$0xff] (!%p283_p2)  ;;  %v373_v14 = vld [vmem:[%s2928_s4 + $0x38] sm:$0xff] (!%p283_p2)  ;;  %v624_v17 = vld [vmem:[%s2927_s3 + $0x20] sm:$0xff] (!%p283_p2) }
   0x9   : > { %2143 = vmatpush3.bf16.msra.mxu0 (!%p283_p2), %v2140_v3  ;;  %643 = vperm.xlu1 (!%p283_p2), %2253, %v622_v10   ;;  %v623_v15 = vld [vmem:[%s2927_s3 + $0x18] sm:$0xff] (!%p283_p2)  ;;  %v2152_v18 = vpack.c.bf16 (!%p283_p2), %v373_v14, %v372_v13  ;;  %v625_v19 = vld [vmem:[%s2927_s3 + $0x28] sm:$0xff] (!%p283_p2)  ;;  %v626_v20 = vld [vmem:[%s2927_s3 + $0x30] sm:$0xff] (!%p283_p2) }
   0xa   : > { %2145 = vmatprep.subr.bf16.mxu0 (!%p283_p2), %v2144_v6  ;;  %v627_v21 = vld [vmem:[%s2927_s3 + $0x38] sm:$0xff] (!%p283_p2)  ;;  %v628_v23 = vld [vmem:[%s2927_s3 + $0x40] sm:$0xff] (!%p283_p2)  ;;  %v629_v25 = vld [vmem:[%s2927_s3 + $0x48] sm:$0xff] (!%p283_p2) }
   0xc   : > { %638 = vperm.xlu0 (!%p283_p2), %2252, %v621_v11  }
   0xd   : > { %s2934_s28 = smov (!%p326_p3, %s1694_s28), 1  ;;  %2147 = vmatpush3.bf16.msra.mxu0 %v2144_v6  ;;  %648 = vperm.xlu1 %2253, %v623_v15  }
   0xe   : > { %s2238_s23 = smul.u32 160, %s2934_s28  ;;  %2149 = vmatprep.subr.bf16.mxu0 %v2148_v12 }
   0xf   : > { %s2462_s29 = smul.u32 80, %s2934_s28 }
  0x10   : > { %s2398_s12 = scalar_lea.vmem %s2924_s0, %s2238_s23  ;;  %653 = vperm.xlu0 %2252, %v624_v17  }
  0x11   : > { %v346_v16 = vld [vmem:[%s2398_s12] sm:$0xff]  ;;  %2151 = vmatpush3.bf16.msra.mxu0 %v2148_v12  ;;  %658 = vperm.xlu1 %2253, %v625_v19   ;;  %v347_v22 = vld [vmem:[%s2398_s12 + $0x8] sm:$0xff]  ;;  %v348_v24 = vld [vmem:[%s2398_s12 + $0x10] sm:$0xff]  ;;  %s2468_s10 = scalar_lea.vmem %s2925_s1, %s2462_s29  ;;  %s2899_s17 = scalar_lea.vmem %s2932_s8, %s2462_s29 }
  0x12   : > { %1920 = vmatprep.mubr.msk.f32.mxu0 %vm374_vm0, %v346_v16  ;;  %2153 = vmatprep.subr.bf16.mxu0 %v2152_v18  ;;  %v349_v26 = vld [vmem:[%s2398_s12 + $0x18] sm:$0xff]  ;;  %v350_v27 = vld [vmem:[%s2398_s12 + $0x20] sm:$0xff]  ;;  %v351_v28 = vld [vmem:[%s2398_s12 + $0x28] sm:$0xff] }
  0x13   : > { %v352_v29 = vld [vmem:[%s2398_s12 + $0x30] sm:$0xff]  ;;  %v353_v30 = vld [vmem:[%s2398_s12 + $0x38] sm:$0xff]  ;;  %v354_v31 = vld [vmem:[%s2398_s12 + $0x40] sm:$0xff] }
  0x14   : > { %663 = vperm.xlu0 %2252, %v626_v20   ;;  %v355_v32 = vld [vmem:[%s2398_s12 + $0x48] sm:$0xff]  ;;  %v356_v33 = vld [vmem:[%s2398_s12 + $0x50] sm:$0xff]  ;;  %v357_v34 = vld [vmem:[%s2398_s12 + $0x58] sm:$0xff] }
  0x15   : > { %2155 = vmatpush3.bf16.msra.mxu0 %v2152_v18  ;;  %668 = vperm.xlu1 %2253, %v627_v21   ;;  %v358_v35 = vld [vmem:[%s2398_s12 + $0x60] sm:$0xff]  ;;  %v359_v36 = vld [vmem:[%s2398_s12 + $0x68] sm:$0xff]  ;;  %v360_v37 = vld [vmem:[%s2398_s12 + $0x70] sm:$0xff] }
  0x16   : > { %v361_v38 = vld [vmem:[%s2398_s12 + $0x78] sm:$0xff]  ;;  %v362_v39 = vld [vmem:[%s2398_s12 + $0x80] sm:$0xff]  ;;  %v363_v40 = vld [vmem:[%s2398_s12 + $0x88] sm:$0xff] }
  0x17   : > { %v364_v41 = vld [vmem:[%s2398_s12 + $0x90] sm:$0xff]  ;;  %v365_v42 = vld [vmem:[%s2398_s12 + $0x98] sm:$0xff]  ;;  %v600_v43 = vld [vmem:[%s2468_s10] sm:$0xff]  ;;  %s340_s12 = scalar_lea.vmem %s2926_s2, %s2462_s29 }
  0x18   : > { %1921 = vmatmul.mubr.msk.f32.vlgmr.msra.gmra.mrb[0].mxu0 %vm374_vm0, %v347_v22  ;;  %673 = vperm.xlu0 %2252, %v628_v23   ;;  %v601_v61 = vld [vmem:[%s2468_s10 + $0x8] sm:$0xff]  ;;  %v602_v63 = vld [vmem:[%s2468_s10 + $0x10] sm:$0xff]  ;;  %v603_v2 = vld [vmem:[%s2468_s10 + $0x18] sm:$0xff] }
  0x19   : > { %1923 = vmatprep.mubr.msk.f32.mxu0 %vm374_vm0, %v348_v24  ;;  %678 = vperm.xlu1 %2253, %v629_v25   ;;  %v604_v4 = vld [vmem:[%s2468_s10 + $0x20] sm:$0xff]  ;;  %v605_v7 = vld [vmem:[%s2468_s10 + $0x28] sm:$0xff]  ;;  %v606_v9 = vld [vmem:[%s2468_s10 + $0x30] sm:$0xff] }
  0x1a   : > { %1970 = vmatprep.mubr.msk.f32.mxu1 %vm691_vm1, %v600_v43  ;;  %v607_v12 = vld [vmem:[%s2468_s10 + $0x38] sm:$0xff]  ;;  %v608_v14 = vld [vmem:[%s2468_s10 + $0x40] sm:$0xff]  ;;  %v609_v17 = vld [vmem:[%s2468_s10 + $0x48] sm:$0xff] }
  0x1b   : > { %v610_v19 = vld [vmem:[%s340_s12] sm:$0xff]  ;;  %v611_v20 = vld [vmem:[%s340_s12 + $0x8] sm:$0xff]  ;;  %v612_v21 = vld [vmem:[%s340_s12 + $0x10] sm:$0xff] }
  0x1c   : > { %1924 = vmatmul.mubr.msk.f32.gmra.mrb[2].mxu0 %vm374_vm0, %v349_v26  ;;  %v613_v22 = vld [vmem:[%s340_s12 + $0x18] sm:$0xff]  ;;  %v614_v23 = vld [vmem:[%s340_s12 + $0x20] sm:$0xff]  ;;  %v615_v24 = vld [vmem:[%s340_s12 + $0x28] sm:$0xff] }
  0x1d   : > { %1926 = vmatprep.mubr.msk.f32.mxu0 %vm374_vm0, %v350_v27  ;;  %v616_v25 = vld [vmem:[%s340_s12 + $0x30] sm:$0xff]  ;;  %v617_v26 = vld [vmem:[%s340_s12 + $0x38] sm:$0xff]  ;;  %v618_v27 = vld [vmem:[%s340_s12 + $0x40] sm:$0xff] }
  0x20   : > { %1927 = vmatmul.mubr.msk.f32.gmra.mrb[4].mxu0 %vm374_vm0, %v351_v28  ;;  %v619_v28 = vld [vmem:[%s340_s12 + $0x48] sm:$0xff] }
  0x21   : > { %1929 = vmatprep.mubr.msk.f32.mxu0 %vm374_vm0, %v352_v29  ;;  %v2303_v29 = vmov 0.0|0.0  }
  0x22   : > { %2196 = vmatprep.subr.bf16.mxu0 %v2303_v29 }
  0x24   : > { %1930 = vmatmul.mubr.msk.f32.gmra.mrb[6].mxu0 %vm374_vm0, %v353_v30  ;;  %v2305_v30 = vmov 0.0  }
  0x25   : > { %1932 = vmatprep.mubr.msk.f32.mxu0 %vm374_vm0, %v354_v31  ;;  %v1183_v31 = vld [vmem:[%s2931_s7] sm:$0xff] }
  0x28   : > { %1933 = vmatmul.mubr.msk.f32.gmra.mrb[8].mxu0 %vm374_vm0, %v355_v32  ;;  %v1184_v32 = vld [vmem:[%s2931_s7 + $0x8] sm:$0xff] }
  0x29   : > { %1935 = vmatprep.mubr.msk.f32.mxu0 %vm374_vm0, %v356_v33  ;;  %v1185_v33 = vld [vmem:[%s2931_s7 + $0x10] sm:$0xff] }
  0x2c   : > { %1936 = vmatmul.mubr.msk.f32.gmra.mrb[10].mxu0 %vm374_vm0, %v357_v34  ;;  %v2579_v34 = vpack.c.bf16 %v1184_v32, %v1183_v31 }
  0x2d   : > { %1938 = vmatprep.mubr.msk.f32.mxu0 %vm374_vm0, %v358_v35  ;;  %v1186_v35 = vld [vmem:[%s2931_s7 + $0x18] sm:$0xff] }
  0x30   : > { %1939 = vmatmul.mubr.msk.f32.gmra.mrb[12].mxu0 %vm374_vm0, %v359_v36  ;;  %v2585_v36 = vpack.c.bf16 %v1186_v35, %v1185_v33 }
  0x31   : > { %1941 = vmatprep.mubr.msk.f32.mxu0 %vm374_vm0, %v360_v37  ;;  %v2593_v37 = vld [vmem:[%s2931_s7 + $0x20] sm:$0xff] }
  0x34   : > { %1942 = vmatmul.mubr.msk.f32.gmra.mrb[14].mxu0 %vm374_vm0, %v361_v38 }
  0x35   : > { %1944 = vmatprep.mubr.msk.f32.mxu0 %vm374_vm0, %v362_v39 }
  0x38   : > { %1945 = vmatmul.mubr.msk.f32.gmra.mrb[16].mxu0 %vm374_vm0, %v363_v40 }
  0x39   : > { %1947 = vmatprep.mubr.msk.f32.mxu0 %vm374_vm0, %v364_v41 }
  0x3c   : > { %1948 = vmatmul.mubr.msk.f32.gmra.mrb[18].mxu0 %vm374_vm0, %v365_v42 }
  0x3d   : > { %2040 = vmatprep.mubr.msk.f32.mxu0 %vm2304_vm2, %v2305_v30 }
  0x87   : > { %v634_v39 = vpop.permute.xlu0 %633 }
  0x88   : > { %v2597_v38 = vpop.permute.xlu1 %643 }
  0x8b   : > { %v639_v41 = vpop.permute.xlu0 %638 }
  0x8c   : > { %v2599_v40 = vpop.permute.xlu1 %648 }
  0xeb   : > { %v2472_v44 = vpop.f32.mrb[0].mxu0 }
  0xec   : > { %v2474_v45 = vpop.f32.mrb[1].mxu0 }
  0xed   : > { %v2156_v46 = vpack.c.bf16 %v2472_v44, %v2474_v45 }
  0xef   : > { %v2478_v47 = vpop.f32.mrb[2].mxu0  ;;  %2157 = vmatprep.subr.bf16.mxu1 %v2156_v46 }
  0xf0   : > { %v2480_v48 = vpop.f32.mrb[3].mxu0  ;;  %2159 = vmatpush3.bf16.msra.mxu1 %v2156_v46  ;;  %v2606_v46 = vld [vmem:[%s2929_s5] ss:$0 sm:$0xff] }
  0xf1   : > { %v2160_v49 = vpack.c.bf16 %v2478_v47, %v2480_v48 }
  0xf3   : > { %v2484_v50 = vpop.f32.mrb[4].mxu0  ;;  %2161 = vmatprep.subr.bf16.mxu1 %v2160_v49 }
  0xf4   : > { %v2486_v51 = vpop.f32.mrb[5].mxu0  ;;  %2163 = vmatpush3.bf16.msra.mxu1 %v2160_v49 }
  0xf5   : > { %v2164_v52 = vpack.c.bf16 %v2484_v50, %v2486_v51 }
  0xf7   : > { %v2490_v53 = vpop.f32.mrb[6].mxu0  ;;  %2165 = vmatprep.subr.bf16.mxu1 %v2164_v52 }
  0xf8   : > { %v2492_v54 = vpop.f32.mrb[7].mxu0  ;;  %2167 = vmatpush3.bf16.msra.mxu1 %v2164_v52 }
  0xf9   : > { %v2168_v55 = vpack.c.bf16 %v2490_v53, %v2492_v54 }
  0xfb   : > { %v2496_v56 = vpop.f32.mrb[8].mxu0  ;;  %2169 = vmatprep.subr.bf16.mxu1 %v2168_v55 }
  0xfc   : > { %v2498_v57 = vpop.f32.mrb[9].mxu0  ;;  %2171 = vmatpush3.bf16.msra.mxu1 %v2168_v55 }
  0xfd   : > { %v2172_v58 = vpack.c.bf16 %v2496_v56, %v2498_v57 }
  0xff   : > { %v2502_v59 = vpop.f32.mrb[10].mxu0  ;;  %2173 = vmatprep.subr.bf16.mxu1 %v2172_v58 }
 0x100   : > { %v2504_v60 = vpop.f32.mrb[11].mxu0  ;;  %2175 = vmatpush3.bf16.msra.mxu1 %v2172_v58  ;;  %v682_v42 = vmul.f32 %v2502_v59, %v639_v41  ;;  %v2608_v58 = vpop.permute.xlu1 %658 }
 0x101   : > { %v2176_v62 = vpack.c.bf16 %v2502_v59, %v2504_v60  ;;  %v681_v43 = vmul.f32 %v634_v39, %v2504_v60 }
 0x103   : > { %v2510_v0 = vpop.f32.mrb[12].mxu0  ;;  %1971 = vmatmul.mubr.msk.f32.vlgmr.msra.gmra.mrb[0].mxu1 %vm691_vm1, %v601_v61  ;;  %2177 = vmatprep.subr.bf16.mxu1 %v2176_v62 }
 0x104   : > { %v2513_v1 = vpop.f32.mrb[13].mxu0  ;;  %2179 = vmatpush3.bf16.msra.mxu1 %v2176_v62  ;;  %1973 = vmatprep.mubr.msk.f32.mxu1 %vm691_vm1, %v602_v63  ;;  %v2610_v62 = vpop.permute.xlu0 %653  ;;  %v684_v63 = vmul.f32 %v2510_v0, %v2599_v40 }
 0x105   : > { %v2180_v3 = vpack.c.bf16 %v2510_v0, %v2513_v1  ;;  %v683_v60 = vmul.f32 %v2597_v38, %v2513_v1 }
 0x107   : > { %v2520_v5 = vpop.f32.mrb[14].mxu0  ;;  %1974 = vmatmul.mubr.msk.f32.gmra.mrb[2].mxu1 %vm691_vm1, %v603_v2  ;;  %2181 = vmatprep.subr.bf16.mxu1 %v2180_v3 }
 0x108   : > { %v2523_v6 = vpop.f32.mrb[15].mxu0  ;;  %2183 = vmatpush3.bf16.msra.mxu1 %v2180_v3  ;;  %1976 = vmatprep.mubr.msk.f32.mxu1 %vm691_vm1, %v604_v4  ;;  %v686_v0 = vmul.f32 %v2520_v5, %v2608_v58 }
 0x109   : > { %v2184_v8 = vpack.c.bf16 %v2520_v5, %v2523_v6  ;;  %v685_v1 = vmul.f32 %v2610_v62, %v2523_v6 }
 0x10b   : > { %v2530_v10 = vpop.f32.mrb[16].mxu0  ;;  %1977 = vmatmul.mubr.msk.f32.gmra.mrb[4].mxu1 %vm691_vm1, %v605_v7  ;;  %2185 = vmatprep.subr.bf16.mxu1 %v2184_v8 }
 0x10c   : > { %v2533_v11 = vpop.f32.mrb[17].mxu0  ;;  %2187 = vmatpush3.bf16.msra.mxu1 %v2184_v8  ;;  %1979 = vmatprep.mubr.msk.f32.mxu1 %vm691_vm1, %v606_v9 }
 0x10d   : > { %v2188_v13 = vpack.c.bf16 %v2530_v10, %v2533_v11 }
 0x10f   : > { %v2544_v15 = vpop.f32.mrb[18].mxu0  ;;  %1980 = vmatmul.mubr.msk.f32.gmra.mrb[6].mxu1 %vm691_vm1, %v607_v12  ;;  %2189 = vmatprep.subr.bf16.mxu1 %v2188_v13 }
 0x110   : > { %v2547_v16 = vpop.f32.mrb[19].mxu0  ;;  %2191 = vmatpush3.bf16.msra.mxu1 %v2188_v13  ;;  %1982 = vmatprep.mubr.msk.f32.mxu1 %vm691_vm1, %v608_v14 }
 0x111   : > { %v2192_v18 = vpack.c.bf16 %v2544_v15, %v2547_v16 }
 0x113   : > { %1983 = vmatmul.mubr.msk.f32.gmra.mrb[8].mxu1 %vm691_vm1, %v609_v17  ;;  %2193 = vmatprep.subr.bf16.mxu1 %v2192_v18  ;;  %v669_v17 = vpop.permute.xlu1 %668 }
 0x114   : > { %2195 = vmatpush3.bf16.msra.mxu1 %v2192_v18  ;;  %2005 = vmatprep.mubr.msk.f32.mxu1 %vm691_vm1, %v610_v19 }
 0x115   : > { %2211 = vmatprep.subr.bf16.mxu1 %v2303_v29 }
 0x117   : > { %2006 = vmatmul.mubr.msk.f32.vlgmr.msra.gmra.mrb[10].mxu1 %vm691_vm1, %v611_v20 }
 0x118   : > { %2008 = vmatprep.mubr.msk.f32.mxu1 %vm691_vm1, %v612_v21  ;;  %2213 = vmatpush3.bf16.msra.mxu1 %v2579_v34  ;;  %v664_v21 = vpop.permute.xlu0 %663 }
 0x119   : > { %2214 = vmatprep.subr.bf16.mxu1 %v2303_v29 }
 0x11b   : > { %2009 = vmatmul.mubr.msk.f32.gmra.mrb[12].mxu1 %vm691_vm1, %v613_v22 }
 0x11c   : > { %2011 = vmatprep.mubr.msk.f32.mxu1 %vm691_vm1, %v614_v23  ;;  %2216 = vmatpush3.bf16.msra.mxu1 %v2585_v36 }
 0x11d   : > { %2063 = vmatprep.subr.mxu1 %v2305_v30 }
 0x11f   : > { %2012 = vmatmul.mubr.msk.f32.gmra.mrb[14].mxu1 %vm691_vm1, %v615_v24 }
 0x120   : > { %2014 = vmatprep.mubr.msk.f32.mxu1 %vm691_vm1, %v616_v25  ;;  %2064 = vmatpush3.msra.mxu1 %v2593_v37 }
 0x121   : > { %2232 = vmatprep.subr.bf16.mxu1 %v2303_v29 }
 0x123   : > { %2015 = vmatmul.mubr.msk.f32.gmra.mrb[16].mxu1 %vm691_vm1, %v617_v26  ;;  %v688_v26 = vmul.f32 %v2530_v10, %v669_v17 }
 0x124   : > { %2017 = vmatprep.mubr.msk.f32.mxu1 %vm691_vm1, %v618_v27 }
 0x127   : > { %2018 = vmatmul.mubr.msk.f32.gmra.mrb[18].mxu1 %vm691_vm1, %v619_v28  ;;  %v687_v28 = vmul.f32 %v664_v21, %v2533_v11 }
 0x128   : > { %2065 = vmatprep.mubr.msk.f32.mxu1 %vm2304_vm2, %v2305_v30 }
 0x1d6   : > { %v1972_v49 = vpop.f32.mrb[0].mxu1 }
 0x1d7   : > { %v794_v52 = vadd.f32 %v1972_v49, %v682_v42  ;;  %v788_v55 = vpop.f32.mrb[1].mxu1  ;;  %v679_v49 = vpop.permute.xlu1 %678 }
 0x1d8   : > { %v789_v61 = vadd.f32 %v788_v55, %v681_v43  ;;  %v2646_v55 = vpop.permute.xlu0 %673 }
 0x1d9   : > { %v2615_v59 = vadd.f32 %v2606_v46, %v794_v52 }
 0x1da   : > { %v2620_v2 = vadd.f32 %v2606_v46, %v789_v61  ;;  %v1975_v3 = vpop.f32.mrb[2].mxu1  ;;  %v690_v61 = vmul.f32 %v2544_v15, %v679_v49 }
 0x1db   : > { %v1019_v4 = vmin.f32 %v2615_v59, 0.0  ;;  %v804_v7 = vadd.f32 %v1975_v3, %v684_v63  ;;  %v798_v8 = vpop.f32.mrb[3].mxu1  ;;  %v689_v3 = vmul.f32 %v2646_v55, %v2547_v16  ;;  %vm1069_vm3 = vcmp.gt.f32.partialorder %v2615_v59, 0.0 }
 0x1dc   : > { %v1018_v9 = vmin.f32 %v2620_v2, 0.0  ;;  %v799_v12 = vadd.f32 %v798_v8, %v683_v60  ;;  %v854_v60 = vmul.f32 %v2472_v44, %v639_v41  ;;  %vm1068_vm4 = vcmp.gt.f32.partialorder %v2620_v2, 0.0 }
 0x1dd   : > { %v1030_v13 = vmul.f32 1.442695, %v1019_v4  ;;  %v2627_v14 = vadd.f32 %v2606_v46, %v804_v7 }
 0x1de   : > { %v1028_v18 = vmul.f32 1.442695, %v1018_v9  ;;  %v2632_v19 = vadd.f32 %v2606_v46, %v799_v12  ;;  %v1978_v20 = vpop.f32.mrb[4].mxu1  ;;  %v853_v9 = vmul.f32 %v634_v39, %v2474_v45 }
 0x1df   : > { %2254 = vpow2.f32 %v1030_v13  ;;  %v1021_v22 = vmin.f32 %v2627_v14, 0.0  ;;  %v814_v23 = vadd.f32 %v1978_v20, %v686_v0  ;;  %v808_v24 = vpop.f32.mrb[5].mxu1  ;;  %v856_v13 = vmul.f32 %v2478_v47, %v2599_v40 }
 0x1e0   : > { %2256 = vpow2.f32 %v1028_v18  ;;  %v1020_v5 = vmin.f32 %v2632_v19, 0.0  ;;  %v809_v25 = vadd.f32 %v808_v24, %v685_v1  ;;  %v855_v1 = vmul.f32 %v2597_v38, %v2480_v48 }
 0x1e1   : > { %v1034_v27 = vmul.f32 1.442695, %v1021_v22  ;;  %v2638_v6 = vadd.f32 %v2606_v46, %v814_v23  ;;  %v2667_v18 = vmul.f32 %v2484_v50, %v2608_v58  ;;  %v2674_v47 = vmul.f32 %v2610_v62, %v2486_v51 }
 0x1e2   : > { %v1032_v31 = vmul.f32 1.442695, %v1020_v5  ;;  %v2642_v32 = vadd.f32 %v2606_v46, %v809_v25  ;;  %v1981_v33 = vpop.f32.mrb[6].mxu1  ;;  %v2677_v40 = vmul.f32 %v2490_v53, %v669_v17  ;;  %v2683_v50 = vmul.f32 %v664_v21, %v2492_v54 }
 0x1e3   : > { %2258 = vpow2.f32 %v1034_v27  ;;  %v1023_v35 = vmin.f32 %v2638_v6, 0.0  ;;  %v824_v42 = vadd.f32 %v1981_v33, %v688_v26  ;;  %v818_v43 = vpop.f32.mrb[7].mxu1  ;;  %v2687_v5 = vmul.f32 %v2496_v56, %v679_v49 }
 0x1e4   : > { %2260 = vpow2.f32 %v1032_v31  ;;  %v1022_v10 = vmin.f32 %v2642_v32, 0.0  ;;  %v819_v52 = vadd.f32 %v818_v43, %v687_v28  ;;  %vm1071_vm5 = vcmp.gt.f32.partialorder %v2627_v14, 0.0 }
 0x1e5   : > { %v1038_v11 = vmul.f32 1.442695, %v1023_v35  ;;  %v2650_v63 = vadd.f32 %v2606_v46, %v824_v42  ;;  %vm1070_vm6 = vcmp.gt.f32.partialorder %v2632_v19, 0.0  ;;  %vm1073_vm7 = vcmp.gt.f32.partialorder %v2638_v6, 0.0 }
 0x1e6   : > { %v1036_v4 = vmul.f32 1.442695, %v1022_v10  ;;  %v2656_v7 = vadd.f32 %v2606_v46, %v819_v52  ;;  %v1984_v8 = vpop.f32.mrb[8].mxu1  ;;  %vm1072_vm8 = vcmp.gt.f32.partialorder %v2642_v32, 0.0 }
 0x1e7   : > { %2262 = vpow2.f32 %v1038_v11  ;;  %v1025_v12 = vmin.f32 %v2650_v63, 0.0  ;;  %v834_v15 = vadd.f32 %v1984_v8, %v690_v61  ;;  %v828_v0 = vpop.f32.mrb[9].mxu1  ;;  %vm1075_vm9 = vcmp.gt.f32.partialorder %v2650_v63, 0.0 }
 0x1e8   : > { %2264 = vpow2.f32 %v1036_v4  ;;  %v1024_v44 = vmin.f32 %v2656_v7, 0.0  ;;  %v829_v41 = vadd.f32 %v828_v0, %v689_v3  ;;  %vm1074_vm10 = vcmp.gt.f32.partialorder %v2656_v7, 0.0 }
 0x1e9   : > { %v2255_v16 = vpop.eup %2254  ;;  %v1042_v45 = vmul.f32 1.442695, %v1025_v12  ;;  %v2670_v39 = vadd.f32 %v2606_v46, %v834_v15 }
 0x1ea   : > { %v2257_v20 = vpop.eup %2256  ;;  %v1040_v22 = vmul.f32 1.442695, %v1024_v44  ;;  %v2680_v23 = vadd.f32 %v2606_v46, %v829_v41  ;;  %v2007_v48 = vpop.f32.mrb[10].mxu1  ;;  %v1745_v38 = vadd.f32 -1.0, %v2255_v16 }
 0x1eb   : > { %2266 = vpow2.f32 %v1042_v45  ;;  %v1027_v58 = vmin.f32 %v2670_v39, 0.0  ;;  %v959_v24 = vpop.f32.mrb[11].mxu1  ;;  %v1744_v51 = vadd.f32 -1.0, %v2257_v20  ;;  %v965_v25 = vadd.f32 %v2007_v48, %v854_v60 }
 0x1ec   : > { %2268 = vpow2.f32 %v1040_v22  ;;  %v1026_v53 = vmin.f32 %v2680_v23, 0.0  ;;  %v960_v26 = vadd.f32 %v959_v24, %v853_v9  ;;  %v1059_v56 = vmul.f32 1.6732632, %v1745_v38 }
 0x1ed   : > { %v2259_v62 = vpop.eup %2258  ;;  %v1046_v17 = vmul.f32 1.442695, %v1027_v58  ;;  %v1058_v35 = vmul.f32 1.6732632, %v1744_v51  ;;  %v2696_v42 = vadd.f32 %v2606_v46, %v965_v25  ;;  %vm1077_vm11 = vcmp.gt.f32.partialorder %v2670_v39, 0.0 }
 0x1ee   : > { %v2261_v54 = vpop.eup %2260  ;;  %v1747_v21 = vadd.f32 -1.0, %v2259_v62  ;;  %v1044_v27 = vmul.f32 1.442695, %v1026_v53  ;;  %v2010_v28 = vpop.f32.mrb[12].mxu1  ;;  %v2699_v10 = vadd.f32 %v2606_v46, %v960_v26  ;;  %v1079_v9 = vsel %vm1069_vm3, %v2615_v59, %v1059_v56 }
 0x1ef   : > { %v1746_v31 = vadd.f32 -1.0, %v2261_v54  ;;  %2270 = vpow2.f32 %v1046_v17  ;;  %v969_v33 = vpop.f32.mrb[13].mxu1  ;;  %v975_v52 = vadd.f32 %v2010_v28, %v856_v13  ;;  %v1099_v4 = vmin.f32 %v2696_v42, 0.0 }
 0x1f0   : > { %2272 = vpow2.f32 %v1044_v27  ;;  %v1061_v49 = vmul.f32 1.6732632, %v1747_v21  ;;  %v970_v61 = vadd.f32 %v969_v33, %v855_v1  ;;  %v1098_v15 = vmin.f32 %v2699_v10, 0.0 }
 0x1f1   : > { %v2263_v43 = vpop.eup %2262  ;;  %v1060_v60 = vmul.f32 1.6732632, %v1746_v31  ;;  %v1078_v13 = vsel %vm1068_vm4, %v2620_v2, %v1058_v35  ;;  %v1110_v41 = vmul.f32 1.442695, %v1099_v4  ;;  %v2712_v16 = vadd.f32 %v2606_v46, %v975_v52 }
 0x1f2   : > { %v2265_v11 = vpop.eup %2264  ;;  %v1749_v3 = vadd.f32 -1.0, %v2263_v43  ;;  %v2013_v8 = vpop.f32.mrb[14].mxu1  ;;  %v1081_v59 = vsel %vm1071_vm5, %v2627_v14, %v1061_v49  ;;  %v1108_v20 = vmul.f32 1.442695, %v1098_v15  ;;  %v2719_v22 = vadd.f32 %v2606_v46, %v970_v61 }
 0x1f3   : > { %v1748_v12 = vadd.f32 -1.0, %v2265_v11  ;;  %v979_v0 = vpop.f32.mrb[15].mxu1  ;;  %v1080_v2 = vsel %vm1070_vm6, %v2632_v19, %v1060_v60  ;;  %2274 = vpow2.f32 %v1110_v41  ;;  %v1101_v58 = vmin.f32 %v2712_v16, 0.0 }
 0x1f4   : > { %v1063_v44 = vmul.f32 1.6732632, %v1749_v3  ;;  %v1089_v14 = vmul.f32 1.050701, %v1079_v9  ;;  %v1088_v51 = vmul.f32 1.050701, %v1078_v13  ;;  %2276 = vpow2.f32 %v1108_v20 }
 0x1f5   : > { %v2267_v1 = vpop.eup %2266  ;;  %v1062_v45 = vmul.f32 1.6732632, %v1748_v12  ;;  %vm1076_vm12 = vcmp.gt.f32.partialorder %v2680_v23, 0.0  ;;  %v1114_v19 = vmul.f32 1.442695, %v1101_v58  ;;  %v985_v26 = vadd.f32 %v2013_v8, %v2667_v18 }
 0x1f6   : > { %v2269_v48 = vpop.eup %2268  ;;  %v1751_v38 = vadd.f32 -1.0, %v2267_v1  ;;  %v2016_v24 = vpop.f32.mrb[16].mxu1  ;;  %v1083_v17 = vsel %vm1073_vm7, %v2638_v6, %v1063_v44  ;;  %v1091_v21 = vmul.f32 1.050701, %v1081_v59  ;;  %v1090_v27 = vmul.f32 1.050701, %v1080_v2 }
 0x1f7   : > { %v1750_v53 = vadd.f32 -1.0, %v2269_v48  ;;  %v989_v62 = vpop.f32.mrb[17].mxu1  ;;  %v1082_v28 = vsel %vm1072_vm8, %v2642_v32, %v1062_v45  ;;  %v1100_v56 = vmin.f32 %v2719_v22, 0.0  ;;  %2278 = vpow2.f32 %v1114_v19 }
 0x1f8   : > { %v1065_v25 = vmul.f32 1.6732632, %v1751_v38  ;;  %v2736_v43 = vadd.f32 %v2606_v46, %v985_v26  ;;  %v861_v18 = vmul.f32 %v2646_v55, %v2498_v57  ;;  %v2740_v49 = vmul.f32 1.050701, %v1083_v17 }
 0x1f9   : > { %v2271_v54 = vpop.eup %2270  ;;  %v1064_v33 = vmul.f32 1.6732632, %v1750_v53  ;;  %v1112_v61 = vmul.f32 1.442695, %v1100_v56  ;;  %v2742_v60 = vmul.f32 1.050701, %v1082_v28  ;;  %v980_v57 = vadd.f32 %v979_v0, %v2674_v47 }
 0x1fa   : > { %v2273_v31 = vpop.eup %2272  ;;  %v1753_v35 = vadd.f32 -1.0, %v2271_v54  ;;  %v2019_v6 = vpop.f32.mrb[18].mxu1  ;;  %v1085_v32 = vsel %vm1075_vm9, %v2650_v63, %v1065_v25  ;;  %vm1149_vm13 = vcmp.gt.f32.partialorder %v2696_v42, 0.0  ;;  %v1103_v4 = vmin.f32 %v2736_v43, 0.0 }
 0x1fb   : > { %v1752_v52 = vadd.f32 -1.0, %v2273_v31  ;;  %v999_v11 = vpop.f32.mrb[19].mxu1  ;;  %vm1148_vm14 = vcmp.gt.f32.partialorder %v2699_v10, 0.0  ;;  %2280 = vpow2.f32 %v1112_v61  ;;  %v2197_v55 = vpack.c.bf16 %v1089_v14, %v1088_v51 }
 0x1fc   : > { %v1067_v3 = vmul.f32 1.6732632, %v1753_v35  ;;  %v1084_v9 = vsel %vm1074_vm10, %v2656_v7, %v1064_v33  ;;  %v1118_v12 = vmul.f32 1.442695, %v1103_v4  ;;  %v995_v15 = vadd.f32 %v2016_v24, %v2677_v40 }
 0x1fd   : > { %v1066_v8 = vmul.f32 1.6732632, %v1752_v52  ;;  %v990_v63 = vadd.f32 %v989_v62, %v2683_v50  ;;  %v2756_v13 = vmul.f32 1.050701, %v1085_v32  ;;  %v2762_v41 = vadd.f32 %v2606_v46, %v980_v57  ;;  %2198 = vmatpush3.bf16.msra.mxu0 %v2197_v55  ;;  %v2275_v0 = vpop.eup %2274 }
 0x1fe   : > { %v1087_v44 = vsel %vm1077_vm11, %v2670_v39, %v1067_v3  ;;  %v2200_v47 = vpack.c.bf16 %v1091_v21, %v1090_v27  ;;  %2282 = vpow2.f32 %v1118_v12  ;;  %v2768_v40 = vadd.f32 %v2606_v46, %v995_v15  ;;  %2199 = vmatprep.subr.bf16.mxu0 %v2303_v29  ;;  %v2277_v39 = vpop.eup %2276 }
 0x1ff   : > { %v1086_v7 = vsel %vm1076_vm12, %v2680_v23, %v1066_v8  ;;  %v2771_v50 = vadd.f32 %v2606_v46, %v990_v63  ;;  %v1094_v1 = vmul.f32 1.050701, %v1084_v9  ;;  %v1755_v59 = vadd.f32 -1.0, %v2275_v0 }
 0x200   : > { %v1102_v45 = vmin.f32 %v2762_v41, 0.0  ;;  %v1005_v20 = vadd.f32 %v2019_v6, %v2687_v5  ;;  %v1097_v48 = vmul.f32 1.050701, %v1087_v44  ;;  %v1754_v2 = vadd.f32 -1.0, %v2277_v39 }
 0x201   : > { %v1105_v23 = vmin.f32 %v2768_v40, 0.0  ;;  %v1104_v38 = vmin.f32 %v2771_v50, 0.0  ;;  %v1096_v58 = vmul.f32 1.050701, %v1086_v7  ;;  %v1139_v24 = vmul.f32 1.6732632, %v1755_v59  ;;  %2201 = vmatpush3.bf16.msra.mxu0 %v2200_v47  ;;  %v2279_v53 = vpop.eup %2278 }
 0x202   : > { %v1116_v14 = vmul.f32 1.442695, %v1102_v45  ;;  %v2779_v51 = vadd.f32 %v2606_v46, %v1005_v20  ;;  %v1138_v62 = vmul.f32 1.6732632, %v1754_v2  ;;  %v1000_v19 = vadd.f32 %v999_v11, %v861_v18  ;;  %2202 = vmatprep.subr.bf16.mxu0 %v2303_v29 }
 0x203   : > { %v1122_v17 = vmul.f32 1.442695, %v1105_v23  ;;  %v1120_v25 = vmul.f32 1.442695, %v1104_v38  ;;  %v1159_v5 = vsel %vm1149_vm13, %v2696_v42, %v1139_v24  ;;  %v1757_v26 = vadd.f32 -1.0, %v2279_v53  ;;  %v1180_v53 = vld [vmem:[%s2930_s6 + $0x10] sm:$0xff] }
 0x204   : > { %2284 = vpow2.f32 %v1116_v14  ;;  %v1107_v54 = vmin.f32 %v2779_v51, 0.0  ;;  %v1169_v21 = vmul.f32 1.050701, %v1159_v5  ;;  %v1158_v27 = vsel %vm1148_vm14, %v2699_v10, %v1138_v62 }
 0x205   : > { %vm1151_vm15 = vcmp.gt.f32.partialorder %v2712_v16, 0.0  ;;  %2286 = vpow2.f32 %v1122_v17  ;;  %v2281_v28 = vpop.eup %2280  ;;  %v1168_v56 = vmul.f32 1.050701, %v1158_v27  ;;  %v1141_v31 = vmul.f32 1.6732632, %v1757_v26  ;;  %v1182_v26 = vld [vmem:[%s2930_s6 + $0x20] sm:$0xff] }
 0x206   : > { %2288 = vpow2.f32 %v1120_v25  ;;  %v1126_v33 = vmul.f32 1.442695, %v1107_v54  ;;  %v1756_v35 = vadd.f32 -1.0, %v2281_v28  ;;  %v2791_v42 = vadd.f32 %v2606_v46, %v1000_v19  ;;  %v1181_v19 = vld [vmem:[%s2930_s6 + $0x18] sm:$0xff] }
 0x207   : > { %v2203_v6 = vpack.c.bf16 %v2740_v49, %v2742_v60  ;;  %v2206_v18 = vpack.c.bf16 %v2756_v13, %v1094_v1  ;;  %v1161_v52 = vsel %vm1151_vm15, %v2712_v16, %v1141_v31  ;;  %v2209_v10 = vpack.c.bf16 %v1097_v48, %v1096_v58 }
 0x208   : > { %2290 = vpow2.f32 %v1126_v33  ;;  %v2218_v61 = vpack.c.bf16 %v1169_v21, %v1168_v56  ;;  %v2283_v11 = vpop.eup %2282  ;;  %v1140_v32 = vmul.f32 1.6732632, %v1756_v35  ;;  %v1106_v3 = vmin.f32 %v2791_v42, 0.0 }
 0x209   : > { %2204 = vmatpush3.bf16.msra.mxu0 %v2203_v6  ;;  %v1171_v4 = vmul.f32 1.050701, %v1161_v52  ;;  %vm1150_vm0 = vcmp.gt.f32.partialorder %v2719_v22, 0.0  ;;  %v1759_v46 = vadd.f32 -1.0, %v2283_v11  ;;  %vm1153_vm3 = vcmp.gt.f32.partialorder %v2736_v43, 0.0 }
 0x20a   : > { %2205 = vmatprep.subr.bf16.mxu0 %v2303_v29  ;;  %v1160_v49 = vsel %vm1150_vm0, %v2719_v22, %v1140_v32  ;;  %v1124_v60 = vmul.f32 1.442695, %v1106_v3  ;;  %v1178_v22 = vld [vmem:[%s2930_s6] sm:$0xff]  ;;  %vm1152_vm4 = vcmp.gt.f32.partialorder %v2762_v41, 0.0  ;;  %vm1155_vm5 = vcmp.gt.f32.partialorder %v2768_v40, 0.0 }
 0x20b   : > { %v1170_v8 = vmul.f32 1.050701, %v1160_v49  ;;  %v1143_v57 = vmul.f32 1.6732632, %v1759_v46  ;;  %vm1154_vm6 = vcmp.gt.f32.partialorder %v2771_v50, 0.0  ;;  %vm1157_vm7 = vcmp.gt.f32.partialorder %v2779_v51, 0.0 }
 0x20c   : > { %2292 = vpow2.f32 %v1124_v60  ;;  %vm1156_vm8 = vcmp.gt.f32.partialorder %v2791_v42, 0.0  ;;  %vm1293_vm9 = vcmask 326656  }
 0x20d   : > { %2207 = vmatpush3.bf16.msra.mxu0 %v2206_v18  ;;  %v2221_v55 = vpack.c.bf16 %v1171_v4, %v1170_v8  ;;  %v1163_v12 = vsel %vm1153_vm3, %v2736_v43, %v1143_v57 }
 0x20e   : > { %v2285_v16 = vpop.eup %2284  ;;  %2208 = vmatprep.subr.bf16.mxu0 %v2303_v29  ;;  %v1173_v7 = vmul.f32 1.050701, %v1163_v12 }
 0x20f   : > { %v2287_v9 = vpop.eup %2286  ;;  %v1758_v15 = vadd.f32 -1.0, %v2285_v16 }
 0x210   : > { %v2289_v63 = vpop.eup %2288  ;;  %v1761_v13 = vadd.f32 -1.0, %v2287_v9 }
 0x211   : > { %v1142_v44 = vmul.f32 1.6732632, %v1758_v15  ;;  %v1760_v47 = vadd.f32 -1.0, %v2289_v63  ;;  %2210 = vmatpush3.bf16.msra.mxu0 %v2209_v10 }
 0x212   : > { %v2291_v0 = vpop.eup %2290  ;;  %v1145_v39 = vmul.f32 1.6732632, %v1761_v13  ;;  %2217 = vmatprep.subr.bf16.mxu0 %v2303_v29 }
 0x213   : > { %v1162_v1 = vsel %vm1152_vm4, %v2762_v41, %v1142_v44  ;;  %v1144_v43 = vmul.f32 1.6732632, %v1760_v47  ;;  %v1763_v59 = vadd.f32 -1.0, %v2291_v0  ;;  %v1179_v41 = vld [vmem:[%s2930_s6 + $0x8] sm:$0xff] }
 0x214   : > { %v1172_v45 = vmul.f32 1.050701, %v1162_v1  ;;  %v1165_v20 = vsel %vm1155_vm5, %v2768_v40, %v1145_v39  ;;  %2041 = vmatmul.mubr.msk.f32.vlgmr.msra.gmra.mrb[20].mxu0 %vm691_vm1, %v1178_v22 }
 0x215   : > { %v1175_v48 = vmul.f32 1.050701, %v1165_v20  ;;  %v1164_v2 = vsel %vm1154_vm6, %v2771_v50, %v1144_v43  ;;  %v1147_v23 = vmul.f32 1.6732632, %v1763_v59  ;;  %2219 = vmatpush3.bf16.msra.mxu0 %v2218_v61  ;;  %2043 = vmatprep.mubr.msk.f32.mxu0 %vm2304_vm2, %v2305_v30 }
 0x216   : > { %v1174_v38 = vmul.f32 1.050701, %v1164_v2  ;;  %2220 = vmatprep.subr.bf16.mxu0 %v2303_v29  ;;  %v2224_v40 = vpack.c.bf16 %v1173_v7, %v1172_v45  ;;  %v2293_v58 = vpop.eup %2292 }
 0x217   : > { %v1167_v24 = vsel %vm1157_vm7, %v2779_v51, %v1147_v23  ;;  %v1762_v14 = vadd.f32 -1.0, %v2293_v58 }
 0x218   : > { %v2227_v50 = vpack.c.bf16 %v1175_v48, %v1174_v38  ;;  %2044 = vmatmul.mubr.msk.f32.gmra.mrb[22].mxu0 %vm691_vm1, %v1179_v41  ;;  %v1177_v17 = vmul.f32 1.050701, %v1167_v24 }
 0x219   : > { %2222 = vmatpush3.bf16.msra.mxu0 %v2221_v55  ;;  %2046 = vmatprep.mubr.msk.f32.mxu0 %vm2304_vm2, %v2305_v30  ;;  %v1146_v62 = vmul.f32 1.6732632, %v1762_v14 }
 0x21a   : > { %2223 = vmatprep.subr.bf16.mxu0 %v2303_v29 }
 0x21b   : > { %v1166_v51 = vsel %vm1156_vm8, %v2791_v42, %v1146_v62 }
 0x21c   : > { %2047 = vmatmul.mubr.msk.f32.gmra.mrb[24].mxu0 %vm691_vm1, %v1180_v53  ;;  %v1176_v25 = vmul.f32 1.050701, %v1166_v51 }
 0x21d   : > { %2225 = vmatpush3.bf16.msra.mxu0 %v2224_v40  ;;  %2049 = vmatprep.mubr.msk.f32.mxu0 %vm2304_vm2, %v2305_v30 }
 0x21e   : > { %2226 = vmatprep.subr.bf16.mxu0 %v2303_v29  ;;  %v2230_v5 = vpack.c.bf16 %v1177_v17, %v1176_v25 }
 0x220   : > { %2050 = vmatmul.mubr.msk.f32.gmra.mrb[26].mxu0 %vm691_vm1, %v1181_v19 }
 0x221   : > { %2228 = vmatpush3.bf16.msra.mxu0 %v2227_v50  ;;  %2052 = vmatprep.mubr.msk.f32.mxu0 %vm2304_vm2, %v2305_v30 }
 0x222   : > { %2229 = vmatprep.subr.bf16.mxu0 %v2303_v29 }
 0x224   : > { %2053 = vmatmul.mubr.msk.f32.gmra.mrb[28].mxu0 %vm691_vm1, %v1182_v26 }
 0x225   : > { %2231 = vmatpush3.bf16.msra.mxu0 %v2230_v5  ;;  %2100 = vmatprep.mubr.msk.f32.mxu0 %vm2304_vm2, %v2305_v30 }
 0x228   : > { %2101 = vmatmul.mubr.msk.f32.vlgmr.msra.gmra.mrb[30].mxu0 %vm691_vm1, %v1178_v22 }
 0x229   : > { %2103 = vmatprep.mubr.msk.f32.mxu0 %vm2304_vm2, %v2305_v30 }
 0x22c   : > { %2104 = vmatmul.mubr.msk.f32.gmra.mrb[32].mxu0 %vm691_vm1, %v1179_v41 }
 0x22d   : > { %2106 = vmatprep.mubr.msk.f32.mxu0 %vm2304_vm2, %v2305_v30 }
 0x230   : > { %2107 = vmatmul.mubr.msk.f32.gmra.mrb[34].mxu0 %vm691_vm1, %v1180_v53 }
 0x231   : > { %2109 = vmatprep.mubr.msk.f32.mxu0 %vm2304_vm2, %v2305_v30 }
 0x234   : > { %2110 = vmatmul.mubr.msk.f32.gmra.mrb[36].mxu0 %vm691_vm1, %v1181_v19 }
 0x235   : > { %2112 = vmatprep.mubr.msk.f32.mxu0 %vm2304_vm2, %v2305_v30 }
 0x238   : > { %2113 = vmatmul.mubr.msk.f32.gmra.mrb[38].mxu0 %vm691_vm1, %v1182_v26  ;;  %vm1599_vm1 = vcmask 162816  }
 0x2e7   : > { %v1269_v54 = vpop.f32.mrb[20].mxu0 }
 0x2e8   : > { %v2042_v21 = vpop.f32.mrb[21].mxu0  ;;  %2066 = vmatmul.mubr.msk.f32.vlgmr.msra.gmra.mrb[20].mxu1 %vm1293_vm9, %v1269_v54 }
 0x2e9   : > { %2234 = vmatpush3.bf16.msra.mxu1 %v2579_v34  ;;  %2068 = vmatprep.mubr.msk.f32.mxu1 %vm2304_vm2, %v2305_v30 }
 0x2ea   : > { %2235 = vmatprep.subr.bf16.mxu1 %v2303_v29 }
 0x2eb   : > { %v1274_v27 = vpop.f32.mrb[22].mxu0 }
 0x2ec   : > { %v2045_v28 = vpop.f32.mrb[23].mxu0  ;;  %2069 = vmatmul.mubr.msk.f32.gmra.mrb[22].mxu1 %vm1293_vm9, %v1274_v27 }
 0x2ed   : > { %2071 = vmatprep.mubr.msk.f32.mxu1 %vm2304_vm2, %v2305_v30  ;;  %2237 = vmatpush3.bf16.msra.mxu1 %v2585_v36 }
 0x2ee   : > { %2123 = vmatprep.subr.mxu1 %v2305_v30 }
 0x2ef   : > { %v1279_v56 = vpop.f32.mrb[24].mxu0 }
 0x2f0   : > { %v2048_v31 = vpop.f32.mrb[25].mxu0  ;;  %2072 = vmatmul.mubr.msk.f32.gmra.mrb[24].mxu1 %vm1293_vm9, %v1279_v56 }
 0x2f1   : > { %2074 = vmatprep.mubr.msk.f32.mxu1 %vm2304_vm2, %v2305_v30  ;;  %2124 = vmatpush3.msra.mxu1 %v2593_v37 }
 0x2f3   : > { %v1284_v29 = vpop.f32.mrb[26].mxu0 }
 0x2f4   : > { %v2051_v34 = vpop.f32.mrb[27].mxu0  ;;  %2075 = vmatmul.mubr.msk.f32.gmra.mrb[26].mxu1 %vm1293_vm9, %v1284_v29 }
 0x2f5   : > { %2077 = vmatprep.mubr.msk.f32.mxu1 %vm2304_vm2, %v2305_v30 }
 0x2f7   : > { %v1289_v33 = vpop.f32.mrb[28].mxu0 }
 0x2f8   : > { %v2054_v36 = vpop.f32.mrb[29].mxu0  ;;  %2078 = vmatmul.mubr.msk.f32.gmra.mrb[28].mxu1 %vm1293_vm9, %v1289_v33 }
 0x2f9   : > { %2125 = vmatprep.mubr.msk.f32.mxu1 %vm2304_vm2, %v2305_v30 }
 0x2fb   : > { %v1465_v35 = vpop.f32.mrb[30].mxu0 }
 0x2fc   : > { %v2102_v42 = vpop.f32.mrb[31].mxu0  ;;  %2126 = vmatmul.mubr.msk.f32.vlgmr.msra.gmra.mrb[30].mxu1 %vm1293_vm9, %v1465_v35 }
 0x2fd   : > { %2128 = vmatprep.mubr.msk.f32.mxu1 %vm2304_vm2, %v2305_v30 }
 0x2ff   : > { %v1470_v37 = vpop.f32.mrb[32].mxu0 }
 0x300   : > { %v2105_v6 = vpop.f32.mrb[33].mxu0  ;;  %2129 = vmatmul.mubr.msk.f32.gmra.mrb[32].mxu1 %vm1293_vm9, %v1470_v37 }
 0x301   : > { %2131 = vmatprep.mubr.msk.f32.mxu1 %vm2304_vm2, %v2305_v30 }
 0x303   : > { %v1475_v18 = vpop.f32.mrb[34].mxu0 }
 0x304   : > { %v2108_v52 = vpop.f32.mrb[35].mxu0  ;;  %2132 = vmatmul.mubr.msk.f32.gmra.mrb[34].mxu1 %vm1293_vm9, %v1475_v18 }
 0x305   : > { %2134 = vmatprep.mubr.msk.f32.mxu1 %vm2304_vm2, %v2305_v30 }
 0x307   : > { %v1480_v10 = vpop.f32.mrb[36].mxu0 }
 0x308   : > { %v2111_v61 = vpop.f32.mrb[37].mxu0  ;;  %2135 = vmatmul.mubr.msk.f32.gmra.mrb[36].mxu1 %vm1293_vm9, %v1480_v10 }
 0x309   : > { %2137 = vmatprep.mubr.msk.f32.mxu1 %vm2304_vm2, %v2305_v30 }
 0x30b   : > { %v1485_v11 = vpop.f32.mrb[38].mxu0 }
 0x30c   : > { %v2114_v32 = vpop.f32.mrb[39].mxu0  ;;  %2138 = vmatmul.mubr.msk.f32.gmra.mrb[38].mxu1 %vm1293_vm9, %v1485_v11 }
 0x3bb   : > { %v1375_v3 = vpop.f32.mrb[20].mxu1 }
 0x3bc   : > { %v1594_v4 = vmul.f32 0.25, %v1375_v3  ;;  %v2067_v46 = vpop.f32.mrb[21].mxu1 }
 0x3be   : > { %1600 = vst.msk [vmem:[%s2899_s17] sm:$0xff] %vm1599_vm1, %v1594_v4 }
 0x3bf   : > { %v1380_v30 = vpop.f32.mrb[22].mxu1 }
 0x3c0   : > { %v1595_v49 = vmul.f32 0.25, %v1380_v30  ;;  %v2070_v60 = vpop.f32.mrb[23].mxu1 }
 0x3c2   : > { %1601 = vst.msk [vmem:[%s2899_s17 + $0x8] sm:$0xff] %vm1599_vm1, %v1595_v49 }
 0x3c3   : > { %v1385_v8 = vpop.f32.mrb[24].mxu1 }
 0x3c4   : > { %v1596_v57 = vmul.f32 0.25, %v1385_v8  ;;  %v2073_v16 = vpop.f32.mrb[25].mxu1 }
 0x3c6   : > { %1602 = vst.msk [vmem:[%s2899_s17 + $0x10] sm:$0xff] %vm1599_vm1, %v1596_v57 }
 0x3c7   : > { %v1390_v55 = vpop.f32.mrb[26].mxu1 }
 0x3c8   : > { %v1597_v9 = vmul.f32 0.25, %v1390_v55  ;;  %v2076_v12 = vpop.f32.mrb[27].mxu1 }
 0x3ca   : > { %1603 = vst.msk [vmem:[%s2899_s17 + $0x18] sm:$0xff] %vm1599_vm1, %v1597_v9 }
 0x3cb   : > { %v1395_v15 = vpop.f32.mrb[28].mxu1 }
 0x3cc   : > { %v1598_v63 = vmul.f32 0.25, %v1395_v15  ;;  %v2079_v13 = vpop.f32.mrb[29].mxu1 }
 0x3ce   : > { %1604 = vst.msk [vmem:[%s2899_s17 + $0x20] sm:$0xff] %vm1599_vm1, %v1598_v63 }
 0x3cf   : > { %v1570_v44 = vpop.f32.mrb[30].mxu1 }
 0x3d0   : > { %v1605_v47 = vmul.f32 0.25, %v1570_v44  ;;  %v2127_v22 = vpop.f32.mrb[31].mxu1 }
 0x3d2   : > { %1610 = vst.msk [vmem:[%s2899_s17 + $0x28] sm:$0xff] %vm1599_vm1, %v1605_v47 }
 0x3d3   : > { %v1575_v0 = vpop.f32.mrb[32].mxu1 }
 0x3d4   : > { %v1606_v7 = vmul.f32 0.25, %v1575_v0  ;;  %v2130_v39 = vpop.f32.mrb[33].mxu1 }
 0x3d6   : > { %1611 = vst.msk [vmem:[%s2899_s17 + $0x30] sm:$0xff] %vm1599_vm1, %v1606_v7 }
 0x3d7   : > { %v1580_v1 = vpop.f32.mrb[34].mxu1 }
 0x3d8   : > { %v1607_v43 = vmul.f32 0.25, %v1580_v1  ;;  %v2133_v59 = vpop.f32.mrb[35].mxu1 }
 0x3da   : > { %1612 = vst.msk [vmem:[%s2899_s17 + $0x38] sm:$0xff] %vm1599_vm1, %v1607_v43 }
 0x3db   : > { %v1585_v45 = vpop.f32.mrb[36].mxu1 }
 0x3dc   : > { %v1608_v20 = vmul.f32 0.25, %v1585_v45  ;;  %v2136_v48 = vpop.f32.mrb[37].mxu1 }
 0x3de   : > { %1613 = vst.msk [vmem:[%s2899_s17 + $0x40] sm:$0xff] %vm1599_vm1, %v1608_v20 }
 0x3df   : > { %v1590_v2 = vpop.f32.mrb[38].mxu1 }
 0x3e0   : > { %v1609_v23 = vmul.f32 0.25, %v1590_v2  ;;  %v2139_v41 = vpop.f32.mrb[39].mxu1 }
 0x3e2   : > { %1614 = vst.msk [vmem:[%s2899_s17 + $0x48] sm:$0xff] %vm1599_vm1, %v1609_v23 }
 0x3e3 PF: > { %s18_s27 = sadd.s32 1, %s2300_s27  }
 0x3e4   : > { %p15_p4 = scmp.ge.s32.totalorder %s18_s27, 4  }
 0x3e6   :  { %17 = sbr.rel (!%p15_p4) target bundleno = 1 (0x1), region = 88 }

</bundles_post_ra>
